<compile_context>
chip_gen: v7x
topology: tpu7x:2x2x1
jax: 0.10.0
libtpu: 0.0.40
codegen_flags: <defaults>
</compile_context>

<pallas_src>
import functools

import jax
import jax.numpy as jnp
from jax import lax
from jax.experimental import pallas as pl
from jax.experimental.pallas import tpu as pltpu

_PREC = lax.Precision.HIGHEST


def _leaky_relu(x, slope):
    return jnp.where(x >= 0, x, slope * x)


def _dot(a, b):
    # small per-point matmuls: keep exact f32
    return jnp.dot(a, b, preferred_element_type=jnp.float32, precision=_PREC)


def _bf16_dot(a, b):
    # large NK-row matmuls: native bf16 MXU feed, f32 accumulation
    return jnp.dot(a.astype(jnp.bfloat16), b.astype(jnp.bfloat16),
                   preferred_element_type=jnp.float32)


def _lfa_kernel(coords_all_ref, coords_t_ref, feat_ref, idx_ref, dist_ref,
                w1_ref, b1_ref,
                wgc_ref, wgn_ref, wgd_ref, bg_ref,
                ws1f_ref, ws1x_ref, wp1f_ref, wp1x_ref, bp1_ref,
                ws2f_ref, ws2x_ref, wp2f_ref, wp2x_ref, bp2_ref,
                wm2_ref, bm2_ref, wsc_ref, bsc_ref,
                out_ref, *, N, K, TN, d_mid):
    NKt = TN * K
    two_d = 2 * d_mid

    coords_all = coords_all_ref[0]        # (N, 3)    full cloud (gather source)
    coords_t = coords_t_ref[0]            # (TN, 3)   this tile's points
    feats = feat_ref[0]                   # (TN, d_in)
    idx = idx_ref[0]                      # (TN*K, 1) int32, rows are n-major
    dist = dist_ref[0]                    # (TN*K, 1) f32

    # ---- the single data-dependent neighbor gather --------------------------
    # one-hot is exactly 0/1 -> bf16; gather is applied AFTER projecting the
    # coords through the folded neighbor weights of BOTH LSE layers, so one
    # (TN*K, N) x (N, 2*d_mid) bf16 matmul serves lse1 and lse2.
    col = lax.broadcasted_iota(jnp.int32, (NKt, N), 1)
    nbr_oh = (idx == col).astype(jnp.bfloat16)                  # (TN*K, N)

    pn_src = _dot(coords_all, wgn_ref[...])                     # (N, 2*d_mid)
    pn = _bf16_dot(nbr_oh, pn_src)                              # (TN*K, 2*d_mid)

    # ---- geometric branch of both LSE mlps (feature-independent) ------------
    # p@wc + p_k@wn + (p - p_k)@wf + d*wd + b == p@(wc+wf) + p_k@(wn-wf) + d*wd + b
    pc = _dot(coords_t, wgc_ref[...])                           # (TN, 2*d_mid)
    geo = pn + dist * wgd_ref[...]                              # (TN*K, 2*d_mid)
    pre = geo.reshape(TN, K, two_d) + pc[:, None, :] + bg_ref[...]
    f_both = jnp.maximum(pre, 0.0)                              # (TN, K, 2*d_mid)
    f1 = f_both[..., :d_mid]                                    # lse1 geometric half
    f2 = f_both[..., d_mid:]                                    # lse2 geometric half

    # ---- mlp1: SharedMLP(d_in, d_out//2) + LeakyReLU(0.2) --------------------
    x1 = _leaky_relu(_dot(feats, w1_ref[...]) + b1_ref[...], 0.2)   # (TN, d_mid)

    def att_pool(f3, x_pts, wsf_ref, wsx_ref, wpf_ref, wpx_ref, bp_ref):
        # AttentivePooling with the channel-concat removed:
        #   scores = softmax_K(cat(f, x_k) @ ws);  pooled = sum_K scores * cat(f, x_k)
        # The x half of `pooled` is exactly x (softmax weights sum to 1 over K and
        # x is constant over K), so only the f half is pooled; ws/wp arrive split.
        cf = f3.shape[-1]
        s = (_bf16_dot(f3.reshape(NKt, cf), wsf_ref[...]).reshape(TN, K, cf)
             + _dot(x_pts, wsx_ref[...])[:, None, :])               # (TN, K, cf)
        m = jnp.max(s, axis=1, keepdims=True)
        e = jnp.exp(s - m)
        denom = jnp.sum(e, axis=1)                                   # (TN, cf)
        pooled_f = jnp.sum(e * f3, axis=1) * pl.reciprocal(denom, approx=True)
        return jnp.maximum(_dot(pooled_f, wpf_ref[...])
                           + _dot(x_pts, wpx_ref[...]) + bp_ref[...], 0.0)

    x2 = att_pool(f1, x1, ws1f_ref, ws1x_ref, wp1f_ref, wp1x_ref, bp1_ref)  # (TN, d_mid)
    x3 = att_pool(f2, x2, ws2f_ref, ws2x_ref, wp2f_ref, wp2x_ref, bp2_ref)  # (TN, 2*d_mid)

    main = _dot(x3, wm2_ref[...]) + bm2_ref[...]                # mlp2     (TN, 4*d_mid)
    sc = _dot(feats, wsc_ref[...]) + bsc_ref[...]               # shortcut
    out_ref[0] = _leaky_relu(main + sc, 0.01)                   # final LeakyReLU


def knn_jax(coords, K):
    """coords (B, N, 3) -> idx (B, N, K) int32, dist (B, N, K) f32 (Euclidean)."""
    d2 = jnp.sum((coords[:, :, None, :] - coords[:, None, :, :]) ** 2, axis=-1)
    neg, idx = lax.top_k(-d2, K)
    return idx.astype(jnp.int32), jnp.sqrt(jnp.maximum(-neg, 0.0))


def init_params(key, d_in, d_out):
    d_mid = d_out // 2
    keys = iter(jax.random.split(key, 40))

    def lin(cin, cout, scale=0.2):
        return scale * jax.random.normal(next(keys), (cin, cout), jnp.float32)

    def vec(c, scale=0.1):
        return scale * jax.random.normal(next(keys), (c,), jnp.float32)

    def bn(c):
        gamma = 1.0 + 0.1 * jax.random.normal(next(keys), (c,), jnp.float32)
        beta = 0.1 * jax.random.normal(next(keys), (c,), jnp.float32)
        mean = 0.1 * jax.random.normal(next(keys), (c,), jnp.float32)
        var = 1.0 + 0.1 * jnp.abs(jax.random.normal(next(keys), (c,), jnp.float32))
        return gamma, beta, mean, var

    def fold(w, b, bnp, eps=1e-6):     # module spec uses BatchNorm2d(eps=1e-06)
        gamma, beta, mean, var = bnp
        s = gamma / jnp.sqrt(var + eps)
        return w * s[None, :], (b - mean) * s + beta

    p = {}
    p['w1'], p['b1'] = lin(d_in, d_mid), vec(d_mid)                      # mlp1 (no bn)
    for tag in ('l1', 'l2'):                                             # lse mlps (bn)
        w, b = fold(lin(10, d_mid), vec(d_mid), bn(d_mid))
        p[f'w{tag}'], p[f'b{tag}'] = w, b
    p['ws1'] = lin(d_out, d_out)                                         # pool1 score (no bias)
    p['wp1'], p['bp1'] = fold(lin(d_out, d_mid), vec(d_mid), bn(d_mid))  # pool1 mlp (bn)
    p['ws2'] = lin(d_out, d_out)                                         # pool2 score
    p['wp2'], p['bp2'] = fold(lin(d_out, d_out), vec(d_out), bn(d_out))  # pool2 mlp (bn)
    p['wm2'], p['bm2'] = lin(d_out, 2 * d_out), vec(2 * d_out)           # mlp2 (no bn)
    p['wsc'], p['bsc'] = fold(lin(d_in, 2 * d_out), vec(2 * d_out), bn(2 * d_out))  # shortcut
    return p


def local_feature_aggregation(coords, features_nchw, params, K, tile_n=None):
    """coords (B,N,3), features (B,d_in,N,1) -> (B, 2*d_out, N, 1)."""
    B, N, _ = coords.shape
    d_in = features_nchw.shape[1]
    d_mid = params['w1'].shape[1]
    d_out = 2 * d_mid

    if tile_n is None:
        tile_n = N
        for cand in (128, 64, 32, 16, 8):
            if N % cand == 0:
                tile_n = cand
                break
    assert N % tile_n == 0 and (tile_n % 8 == 0 or tile_n == N), (N, tile_n)
    T = N // tile_n
    NKt = tile_n * K

    coords = coords.astype(jnp.float32)
    feats = jnp.transpose(features_nchw[..., 0], (0, 2, 1)).astype(jnp.float32)  # (B,N,d_in)
    idx, dist = knn_jax(coords, K)            # external knn (CPU in the torch module)
    idx_f = idx.reshape(B, N * K, 1)          # n-major rows: r = n*K + k (tile-contiguous)
    dist_f = dist.reshape(B, N * K, 1)

    def b2(v):
        return v.reshape(1, -1)

    wl1, wl2 = params['wl1'], params['wl2']   # (10, d_mid): rows 0-2 p, 3-5 p_k, 6-8 p-p_k, 9 dist
    wgc = jnp.concatenate([wl1[0:3] + wl1[6:9], wl2[0:3] + wl2[6:9]], axis=1)   # (3, 2*d_mid)
    wgn = jnp.concatenate([wl1[3:6] - wl1[6:9], wl2[3:6] - wl2[6:9]], axis=1)   # (3, 2*d_mid)
    wgd = jnp.concatenate([wl1[9:10], wl2[9:10]], axis=1)                        # (1, 2*d_mid)
    bg = jnp.concatenate([params['bl1'], params['bl2']]).reshape(1, -1)          # (1, 2*d_mid)

    ws1, ws2, wp1, wp2 = params['ws1'], params['ws2'], params['wp1'], params['wp2']
    weights = [
        params['w1'], b2(params['b1']),
        wgc, wgn, wgd, bg,
        ws1[:d_mid, :d_mid], ws1[d_mid:, :d_mid],        # score: f-rows / x-rows, f-cols only
        wp1[:d_mid], wp1[d_mid:], b2(params['bp1']),     # pool1 mlp: f-half / x-half
        ws2[:d_mid, :d_mid], ws2[d_mid:, :d_mid],
        wp2[:d_mid], wp2[d_mid:], b2(params['bp2']),
        params['wm2'], b2(params['bm2']),
        params['wsc'], b2(params['bsc']),
    ]

    in_specs = [
        pl.BlockSpec((1, N, 3), lambda b, t: (b, 0, 0)),          # full cloud (gather src)
        pl.BlockSpec((1, tile_n, 3), lambda b, t: (b, t, 0)),     # tile centers
        pl.BlockSpec((1, tile_n, d_in), lambda b, t: (b, t, 0)),
        pl.BlockSpec((1, NKt, 1), lambda b, t: (b, t, 0)),
        pl.BlockSpec((1, NKt, 1), lambda b, t: (b, t, 0)),
    ] + [pl.BlockSpec(w.shape, lambda b, t: (0, 0)) for w in weights]

    kernel = functools.partial(_lfa_kernel, N=N, K=K, TN=tile_n, d_mid=d_mid)
    out = pl.pallas_call(
        kernel,
        out_shape=jax.ShapeDtypeStruct((B, N, 2 * d_out), jnp.float32),
        grid=(B, T),
        in_specs=in_specs,
        out_specs=pl.BlockSpec((1, tile_n, 2 * d_out), lambda b, t: (b, t, 0)),
        compiler_params=pltpu.CompilerParams(
            dimension_semantics=("parallel", "parallel"),
            vmem_limit_bytes=48 * 1024 * 1024),
    )(coords, coords, feats, idx_f, dist_f, *weights)

    return jnp.transpose(out, (0, 2, 1))[..., None]        # back to NCHW (B, 2*d_out, N, 1)


def reference_forward(coords, features_nchw, params, K):
    """Pure-JAX reference mirroring the PyTorch forward (same folded params)."""
    B, N, _ = coords.shape
    feats = jnp.transpose(features_nchw[..., 0], (0, 2, 1)).astype(jnp.float32)
    idx, dist = knn_jax(coords, K)

    x1 = _leaky_relu(jnp.einsum('bnc,cd->bnd', feats, params['w1'], precision=_PREC)
                     + params['b1'], 0.2)

    neighbors = jax.vmap(lambda c, i: c[i])(coords, idx)                 # (B, N, K, 3)
    center = jnp.broadcast_to(coords[:, :, None, :], neighbors.shape)

    def lse(wl, bl, x):
        enc = jnp.concatenate([center, neighbors, center - neighbors, dist[..., None]], axis=-1)
        f = jnp.maximum(jnp.einsum('bnkc,cd->bnkd', enc, wl, precision=_PREC) + bl, 0.0)
        xk = jnp.broadcast_to(x[:, :, None, :], (B, N, K, x.shape[-1]))
        return jnp.concatenate([f, xk], axis=-1)

    def pool(xc, ws, wp, bp):
        s = jax.nn.softmax(jnp.einsum('bnkc,cd->bnkd', xc, ws, precision=_PREC), axis=2)
        pooled = jnp.sum(s * xc, axis=2)
        return jnp.maximum(jnp.einsum('bnc,cd->bnd', pooled, wp, precision=_PREC) + bp, 0.0)

    xc1 = lse(params['wl1'], params['bl1'], x1)
    x2 = pool(xc1, params['ws1'], params['wp1'], params['bp1'])
    xc2 = lse(params['wl2'], params['bl2'], x2)
    x3 = pool(xc2, params['ws2'], params['wp2'], params['bp2'])
    out = _leaky_relu(
        jnp.einsum('bnc,cd->bnd', x3, params['wm2'], precision=_PREC) + params['bm2']
        + jnp.einsum('bnc,cd->bnd', feats, params['wsc'], precision=_PREC) + params['bsc'],
        0.01)
    return jnp.transpose(out, (0, 2, 1))[..., None]


if __name__ == "__main__":
    B, N, K = 2, 16, 8            # K and tile_n multiples of 8 keep reshapes layout-free
    d_in, d_out = 8, 16

    key = jax.random.PRNGKey(0)
    kc, kf, kp = jax.random.split(key, 3)
    coords = jax.random.normal(kc, (B, N, 3), jnp.float32)
    features = jax.random.normal(kf, (B, d_in, N, 1), jnp.float32)   # NCHW, like torch
    params = init_params(kp, d_in, d_out)

    # tile_n=8 -> grid (B, 2): exercises the point-tiled path even at toy size
    out = jax.block_until_ready(
        local_feature_aggregation(coords, features, params, K, tile_n=8))
    assert out.shape == (B, 2 * d_out, N, 1), out.shape

    ref = jax.block_until_ready(reference_forward(coords, features, params, K))
    err = float(jnp.max(jnp.abs(out - ref)))
    # tolerance accounts for the bf16 gather/score matmuls and approx reciprocal
    if not jnp.allclose(out, ref, rtol=3e-2, atol=3e-2):
        raise AssertionError(f"mismatch vs reference: max abs err = {err}")

    print("KERNEL_OK")
</pallas_src>

<mosaic_0001>
module attributes {stable_mosaic.version = 11 : i64} {
  func.func @_lfa_kernel(%arg0: i32, %arg1: i32, %arg2: memref<1x16x3xf32, #tpu.memory_space<vmem>>, %arg3: memref<1x8x3xf32, #tpu.memory_space<vmem>>, %arg4: memref<1x8x8xf32, #tpu.memory_space<vmem>>, %arg5: memref<1x64x1xi32, #tpu.memory_space<vmem>>, %arg6: memref<1x64x1xf32, #tpu.memory_space<vmem>>, %arg7: memref<8x8xf32, #tpu.memory_space<vmem>>, %arg8: memref<1x8xf32, #tpu.memory_space<vmem>>, %arg9: memref<3x16xf32, #tpu.memory_space<vmem>>, %arg10: memref<3x16xf32, #tpu.memory_space<vmem>>, %arg11: memref<1x16xf32, #tpu.memory_space<vmem>>, %arg12: memref<1x16xf32, #tpu.memory_space<vmem>>, %arg13: memref<8x8xf32, #tpu.memory_space<vmem>>, %arg14: memref<8x8xf32, #tpu.memory_space<vmem>>, %arg15: memref<8x8xf32, #tpu.memory_space<vmem>>, %arg16: memref<8x8xf32, #tpu.memory_space<vmem>>, %arg17: memref<1x8xf32, #tpu.memory_space<vmem>>, %arg18: memref<8x8xf32, #tpu.memory_space<vmem>>, %arg19: memref<8x8xf32, #tpu.memory_space<vmem>>, %arg20: memref<8x16xf32, #tpu.memory_space<vmem>>, %arg21: memref<8x16xf32, #tpu.memory_space<vmem>>, %arg22: memref<1x16xf32, #tpu.memory_space<vmem>>, %arg23: memref<16x32xf32, #tpu.memory_space<vmem>>, %arg24: memref<1x32xf32, #tpu.memory_space<vmem>>, %arg25: memref<8x32xf32, #tpu.memory_space<vmem>>, %arg26: memref<1x32xf32, #tpu.memory_space<vmem>>, %arg27: memref<1x8x32xf32, #tpu.memory_space<vmem>>) attributes {dimension_semantics = [#tpu.dimension_semantics<parallel>, #tpu.dimension_semantics<parallel>], iteration_bounds = array<i64: 2, 2>, scalar_prefetch = 0 : i64, scratch_operands = 0 : i64, tpu.core_type = #tpu.core_type<tc>, window_params = [{transform_indices = @transform_0, window_bounds = array<i64: 1, 16, 3>}, {transform_indices = @transform_1, window_bounds = array<i64: 1, 8, 3>}, {transform_indices = @transform_2, window_bounds = array<i64: 1, 8, 8>}, {transform_indices = @transform_3, window_bounds = array<i64: 1, 64, 1>}, {transform_indices = @transform_4, window_bounds = array<i64: 1, 64, 1>}, {pipeline_mode = #tpu.pipeline_mode<synchronous>, transform_indices = @transform_5, window_bounds = array<i64: 8, 8>}, {pipeline_mode = #tpu.pipeline_mode<synchronous>, transform_indices = @transform_6, window_bounds = array<i64: 1, 8>}, {pipeline_mode = #tpu.pipeline_mode<synchronous>, transform_indices = @transform_7, window_bounds = array<i64: 3, 16>}, {pipeline_mode = #tpu.pipeline_mode<synchronous>, transform_indices = @transform_8, window_bounds = array<i64: 3, 16>}, {pipeline_mode = #tpu.pipeline_mode<synchronous>, transform_indices = @transform_9, window_bounds = array<i64: 1, 16>}, {pipeline_mode = #tpu.pipeline_mode<synchronous>, transform_indices = @transform_10, window_bounds = array<i64: 1, 16>}, {pipeline_mode = #tpu.pipeline_mode<synchronous>, transform_indices = @transform_11, window_bounds = array<i64: 8, 8>}, {pipeline_mode = #tpu.pipeline_mode<synchronous>, transform_indices = @transform_12, window_bounds = array<i64: 8, 8>}, {pipeline_mode = #tpu.pipeline_mode<synchronous>, transform_indices = @transform_13, window_bounds = array<i64: 8, 8>}, {pipeline_mode = #tpu.pipeline_mode<synchronous>, transform_indices = @transform_14, window_bounds = array<i64: 8, 8>}, {pipeline_mode = #tpu.pipeline_mode<synchronous>, transform_indices = @transform_15, window_bounds = array<i64: 1, 8>}, {pipeline_mode = #tpu.pipeline_mode<synchronous>, transform_indices = @transform_16, window_bounds = array<i64: 8, 8>}, {pipeline_mode = #tpu.pipeline_mode<synchronous>, transform_indices = @transform_17, window_bounds = array<i64: 8, 8>}, {pipeline_mode = #tpu.pipeline_mode<synchronous>, transform_indices = @transform_18, window_bounds = array<i64: 8, 16>}, {pipeline_mode = #tpu.pipeline_mode<synchronous>, transform_indices = @transform_19, window_bounds = array<i64: 8, 16>}, {pipeline_mode = #tpu.pipeline_mode<synchronous>, transform_indices = @transform_20, window_bounds = array<i64: 1, 16>}, {pipeline_mode = #tpu.pipeline_mode<synchronous>, transform_indices = @transform_21, window_bounds = array<i64: 16, 32>}, {pipeline_mode = #tpu.pipeline_mode<synchronous>, transform_indices = @transform_22, window_bounds = array<i64: 1, 32>}, {pipeline_mode = #tpu.pipeline_mode<synchronous>, transform_indices = @transform_23, window_bounds = array<i64: 8, 32>}, {pipeline_mode = #tpu.pipeline_mode<synchronous>, transform_indices = @transform_24, window_bounds = array<i64: 1, 32>}, {transform_indices = @transform_25, window_bounds = array<i64: 1, 8, 32>}]} {
    %c0 = arith.constant 0 : index
    %c0_0 = arith.constant 0 : index
    %c0_1 = arith.constant 0 : index
    %0 = vector.load %arg2[%c0, %c0_0, %c0_1] : memref<1x16x3xf32, #tpu.memory_space<vmem>>, vector<1x16x3xf32>
    %1 = vector.shape_cast %0 : vector<1x16x3xf32> to vector<16x3xf32>
    %c0_2 = arith.constant 0 : index
    %c0_3 = arith.constant 0 : index
    %c0_4 = arith.constant 0 : index
    %2 = vector.load %arg3[%c0_2, %c0_3, %c0_4] : memref<1x8x3xf32, #tpu.memory_space<vmem>>, vector<1x8x3xf32>
    %3 = vector.shape_cast %2 : vector<1x8x3xf32> to vector<8x3xf32>
    %c0_5 = arith.constant 0 : index
    %c0_6 = arith.constant 0 : index
    %c0_7 = arith.constant 0 : index
    %4 = vector.load %arg4[%c0_5, %c0_6, %c0_7] : memref<1x8x8xf32, #tpu.memory_space<vmem>>, vector<1x8x8xf32>
    %5 = vector.shape_cast %4 : vector<1x8x8xf32> to vector<8x8xf32>
    %c0_8 = arith.constant 0 : index
    %c0_9 = arith.constant 0 : index
    %c0_10 = arith.constant 0 : index
    %6 = vector.load %arg5[%c0_8, %c0_9, %c0_10] : memref<1x64x1xi32, #tpu.memory_space<vmem>>, vector<1x64x1xi32>
    %7 = vector.shape_cast %6 : vector<1x64x1xi32> to vector<64x1xi32>
    %c0_11 = arith.constant 0 : index
    %c0_12 = arith.constant 0 : index
    %c0_13 = arith.constant 0 : index
    %8 = vector.load %arg6[%c0_11, %c0_12, %c0_13] : memref<1x64x1xf32, #tpu.memory_space<vmem>>, vector<1x64x1xf32>
    %9 = vector.shape_cast %8 : vector<1x64x1xf32> to vector<64x1xf32>
    %10 = tpu.iota {dimensions = array<i32: 1>} : vector<64x16xi32>
    %11 = vector.broadcast %7 : vector<64x1xi32> to vector<64x16xi32>
    %12 = arith.cmpi eq, %11, %10 : vector<64x16xi32>
    %13 = arith.extui %12 : vector<64x16xi1> to vector<64x16xi32>
    %14 = arith.sitofp %13 : vector<64x16xi32> to vector<64x16xf32>
    %15 = arith.truncf %14 : vector<64x16xf32> to vector<64x16xbf16>
    %c0_14 = arith.constant 0 : index
    %c0_15 = arith.constant 0 : index
    %16 = vector.load %arg10[%c0_14, %c0_15] : memref<3x16xf32, #tpu.memory_space<vmem>>, vector<3x16xf32>
    %cst = arith.constant dense<0.000000e+00> : vector<16x16xf32>
    %17 = tpu.matmul %1, %16, %cst {dimension_numbers = #tpu.dot_dimension_numbers<[1], [0], [0], [1], [0, 0, 1, 1], [], []>, precision = #tpu.contract_precision<fp32>} : vector<16x3xf32>, vector<3x16xf32>, vector<16x16xf32> -> vector<16x16xf32>
    %18 = arith.truncf %17 : vector<16x16xf32> to vector<16x16xbf16>
    %cst_16 = arith.constant dense<0.000000e+00> : vector<64x16xf32>
    %19 = tpu.matmul %15, %18, %cst_16 {dimension_numbers = #tpu.dot_dimension_numbers<[1], [0], [0], [1], [0, 0, 1, 1], [], []>} : vector<64x16xbf16>, vector<16x16xbf16>, vector<64x16xf32> -> vector<64x16xf32>
    %c0_17 = arith.constant 0 : index
    %c0_18 = arith.constant 0 : index
    %20 = vector.load %arg9[%c0_17, %c0_18] : memref<3x16xf32, #tpu.memory_space<vmem>>, vector<3x16xf32>
    %cst_19 = arith.constant dense<0.000000e+00> : vector<8x16xf32>
    %21 = tpu.matmul %3, %20, %cst_19 {dimension_numbers = #tpu.dot_dimension_numbers<[1], [0], [0], [1], [0, 0, 1, 1], [], []>, precision = #tpu.contract_precision<fp32>} : vector<8x3xf32>, vector<3x16xf32>, vector<8x16xf32> -> vector<8x16xf32>
    %c0_20 = arith.constant 0 : index
    %c0_21 = arith.constant 0 : index
    %22 = vector.load %arg11[%c0_20, %c0_21] : memref<1x16xf32, #tpu.memory_space<vmem>>, vector<1x16xf32>
    %23 = vector.broadcast %9 : vector<64x1xf32> to vector<64x16xf32>
    %24 = vector.broadcast %22 : vector<1x16xf32> to vector<64x16xf32>
    %25 = arith.mulf %23, %24 : vector<64x16xf32>
    %26 = arith.addf %19, %25 : vector<64x16xf32>
    %27 = vector.shape_cast %26 : vector<64x16xf32> to vector<8x8x16xf32>
    %28 = vector.shape_cast %21 : vector<8x16xf32> to vector<8x1x16xf32>
    %29 = vector.broadcast %28 : vector<8x1x16xf32> to vector<8x8x16xf32>
    %30 = arith.addf %27, %29 : vector<8x8x16xf32>
    %c0_22 = arith.constant 0 : index
    %c0_23 = arith.constant 0 : index
    %31 = vector.load %arg12[%c0_22, %c0_23] : memref<1x16xf32, #tpu.memory_space<vmem>>, vector<1x16xf32>
    %32 = vector.shape_cast %31 : vector<1x16xf32> to vector<1x1x16xf32>
    %33 = vector.broadcast %32 : vector<1x1x16xf32> to vector<8x8x16xf32>
    %34 = arith.addf %30, %33 : vector<8x8x16xf32>
    %cst_24 = arith.constant 0.000000e+00 : f32
    %35 = vector.broadcast %cst_24 : f32 to vector<8x8x16xf32>
    %36 = arith.maximumf %34, %35 : vector<8x8x16xf32>
    %37 = vector.extract_strided_slice %36 {offsets = [0, 0, 0], sizes = [8, 8, 8], strides = [1, 1, 1]} : vector<8x8x16xf32> to vector<8x8x8xf32>
    %38 = vector.extract_strided_slice %36 {offsets = [0, 0, 8], sizes = [8, 8, 8], strides = [1, 1, 1]} : vector<8x8x16xf32> to vector<8x8x8xf32>
    %c0_25 = arith.constant 0 : index
    %c0_26 = arith.constant 0 : index
    %39 = vector.load %arg7[%c0_25, %c0_26] : memref<8x8xf32, #tpu.memory_space<vmem>>, vector<8x8xf32>
    %cst_27 = arith.constant dense<0.000000e+00> : vector<8x8xf32>
    %40 = tpu.matmul %5, %39, %cst_27 {dimension_numbers = #tpu.dot_dimension_numbers<[1], [0], [0], [1], [0, 0, 1, 1], [], []>, precision = #tpu.contract_precision<fp32>} : vector<8x8xf32>, vector<8x8xf32>, vector<8x8xf32> -> vector<8x8xf32>
    %c0_28 = arith.constant 0 : index
    %c0_29 = arith.constant 0 : index
    %41 = vector.load %arg8[%c0_28, %c0_29] : memref<1x8xf32, #tpu.memory_space<vmem>>, vector<1x8xf32>
    %42 = vector.broadcast %41 : vector<1x8xf32> to vector<8x8xf32>
    %43 = arith.addf %40, %42 : vector<8x8xf32>
    %cst_30 = arith.constant 0.000000e+00 : f32
    %44 = vector.broadcast %cst_30 : f32 to vector<8x8xf32>
    %45 = arith.cmpf oge, %43, %44 : vector<8x8xf32>
    %cst_31 = arith.constant 2.000000e-01 : f32
    %46 = vector.broadcast %cst_31 : f32 to vector<8x8xf32>
    %47 = arith.mulf %46, %43 : vector<8x8xf32>
    %48 = arith.select %45, %43, %47 : vector<8x8xi1>, vector<8x8xf32>
    %49 = vector.shape_cast %37 : vector<8x8x8xf32> to vector<64x8xf32>
    %c0_32 = arith.constant 0 : index
    %c0_33 = arith.constant 0 : index
    %50 = vector.load %arg13[%c0_32, %c0_33] : memref<8x8xf32, #tpu.memory_space<vmem>>, vector<8x8xf32>
    %51 = arith.truncf %49 : vector<64x8xf32> to vector<64x8xbf16>
    %52 = arith.truncf %50 : vector<8x8xf32> to vector<8x8xbf16>
    %cst_34 = arith.constant dense<0.000000e+00> : vector<64x8xf32>
    %53 = tpu.matmul %51, %52, %cst_34 {dimension_numbers = #tpu.dot_dimension_numbers<[1], [0], [0], [1], [0, 0, 1, 1], [], []>} : vector<64x8xbf16>, vector<8x8xbf16>, vector<64x8xf32> -> vector<64x8xf32>
    %54 = vector.shape_cast %53 : vector<64x8xf32> to vector<8x8x8xf32>
    %c0_35 = arith.constant 0 : index
    %c0_36 = arith.constant 0 : index
    %55 = vector.load %arg14[%c0_35, %c0_36] : memref<8x8xf32, #tpu.memory_space<vmem>>, vector<8x8xf32>
    %cst_37 = arith.constant dense<0.000000e+00> : vector<8x8xf32>
    %56 = tpu.matmul %48, %55, %cst_37 {dimension_numbers = #tpu.dot_dimension_numbers<[1], [0], [0], [1], [0, 0, 1, 1], [], []>, precision = #tpu.contract_precision<fp32>} : vector<8x8xf32>, vector<8x8xf32>, vector<8x8xf32> -> vector<8x8xf32>
    %57 = vector.shape_cast %56 : vector<8x8xf32> to vector<8x1x8xf32>
    %58 = vector.broadcast %57 : vector<8x1x8xf32> to vector<8x8x8xf32>
    %59 = arith.addf %54, %58 : vector<8x8x8xf32>
    %cst_38 = arith.constant dense<0xFF800000> : vector<8x8xf32>
    %60 = vector.multi_reduction <maximumf>, %59, %cst_38 [1] : vector<8x8x8xf32> to vector<8x8xf32>
    %61 = vector.shape_cast %60 : vector<8x8xf32> to vector<8x1x8xf32>
    %62 = vector.broadcast %61 : vector<8x1x8xf32> to vector<8x8x8xf32>
    %63 = arith.subf %59, %62 : vector<8x8x8xf32>
    %64 = math.exp %63 : vector<8x8x8xf32>
    %cst_39 = arith.constant dense<0.000000e+00> : vector<8x8xf32>
    %65 = vector.multi_reduction <add>, %64, %cst_39 [1] : vector<8x8x8xf32> to vector<8x8xf32>
    %66 = arith.mulf %64, %37 : vector<8x8x8xf32>
    %cst_40 = arith.constant dense<0.000000e+00> : vector<8x8xf32>
    %67 = vector.multi_reduction <add>, %66, %cst_40 [1] : vector<8x8x8xf32> to vector<8x8xf32>
    %68 = tpu.reciprocal %65 {approx = true} : vector<8x8xf32> -> vector<8x8xf32>
    %69 = arith.mulf %67, %68 : vector<8x8xf32>
    %c0_41 = arith.constant 0 : index
    %c0_42 = arith.constant 0 : index
    %70 = vector.load %arg15[%c0_41, %c0_42] : memref<8x8xf32, #tpu.memory_space<vmem>>, vector<8x8xf32>
    %cst_43 = arith.constant dense<0.000000e+00> : vector<8x8xf32>
    %71 = tpu.matmul %69, %70, %cst_43 {dimension_numbers = #tpu.dot_dimension_numbers<[1], [0], [0], [1], [0, 0, 1, 1], [], []>, precision = #tpu.contract_precision<fp32>} : vector<8x8xf32>, vector<8x8xf32>, vector<8x8xf32> -> vector<8x8xf32>
    %c0_44 = arith.constant 0 : index
    %c0_45 = arith.constant 0 : index
    %72 = vector.load %arg16[%c0_44, %c0_45] : memref<8x8xf32, #tpu.memory_space<vmem>>, vector<8x8xf32>
    %cst_46 = arith.constant dense<0.000000e+00> : vector<8x8xf32>
    %73 = tpu.matmul %48, %72, %cst_46 {dimension_numbers = #tpu.dot_dimension_numbers<[1], [0], [0], [1], [0, 0, 1, 1], [], []>, precision = #tpu.contract_precision<fp32>} : vector<8x8xf32>, vector<8x8xf32>, vector<8x8xf32> -> vector<8x8xf32>
    %74 = arith.addf %71, %73 : vector<8x8xf32>
    %c0_47 = arith.constant 0 : index
    %c0_48 = arith.constant 0 : index
    %75 = vector.load %arg17[%c0_47, %c0_48] : memref<1x8xf32, #tpu.memory_space<vmem>>, vector<1x8xf32>
    %76 = vector.broadcast %75 : vector<1x8xf32> to vector<8x8xf32>
    %77 = arith.addf %74, %76 : vector<8x8xf32>
    %cst_49 = arith.constant 0.000000e+00 : f32
    %78 = vector.broadcast %cst_49 : f32 to vector<8x8xf32>
    %79 = arith.maximumf %77, %78 : vector<8x8xf32>
    %80 = vector.shape_cast %38 : vector<8x8x8xf32> to vector<64x8xf32>
    %c0_50 = arith.constant 0 : index
    %c0_51 = arith.constant 0 : index
    %81 = vector.load %arg18[%c0_50, %c0_51] : memref<8x8xf32, #tpu.memory_space<vmem>>, vector<8x8xf32>
    %82 = arith.truncf %80 : vector<64x8xf32> to vector<64x8xbf16>
    %83 = arith.truncf %81 : vector<8x8xf32> to vector<8x8xbf16>
    %cst_52 = arith.constant dense<0.000000e+00> : vector<64x8xf32>
    %84 = tpu.matmul %82, %83, %cst_52 {dimension_numbers = #tpu.dot_dimension_numbers<[1], [0], [0], [1], [0, 0, 1, 1], [], []>} : vector<64x8xbf16>, vector<8x8xbf16>, vector<64x8xf32> -> vector<64x8xf32>
    %85 = vector.shape_cast %84 : vector<64x8xf32> to vector<8x8x8xf32>
    %c0_53 = arith.constant 0 : index
    %c0_54 = arith.constant 0 : index
    %86 = vector.load %arg19[%c0_53, %c0_54] : memref<8x8xf32, #tpu.memory_space<vmem>>, vector<8x8xf32>
    %cst_55 = arith.constant dense<0.000000e+00> : vector<8x8xf32>
    %87 = tpu.matmul %79, %86, %cst_55 {dimension_numbers = #tpu.dot_dimension_numbers<[1], [0], [0], [1], [0, 0, 1, 1], [], []>, precision = #tpu.contract_precision<fp32>} : vector<8x8xf32>, vector<8x8xf32>, vector<8x8xf32> -> vector<8x8xf32>
    %88 = vector.shape_cast %87 : vector<8x8xf32> to vector<8x1x8xf32>
    %89 = vector.broadcast %88 : vector<8x1x8xf32> to vector<8x8x8xf32>
    %90 = arith.addf %85, %89 : vector<8x8x8xf32>
    %cst_56 = arith.constant dense<0xFF800000> : vector<8x8xf32>
    %91 = vector.multi_reduction <maximumf>, %90, %cst_56 [1] : vector<8x8x8xf32> to vector<8x8xf32>
    %92 = vector.shape_cast %91 : vector<8x8xf32> to vector<8x1x8xf32>
    %93 = vector.broadcast %92 : vector<8x1x8xf32> to vector<8x8x8xf32>
    %94 = arith.subf %90, %93 : vector<8x8x8xf32>
    %95 = math.exp %94 : vector<8x8x8xf32>
    %cst_57 = arith.constant dense<0.000000e+00> : vector<8x8xf32>
    %96 = vector.multi_reduction <add>, %95, %cst_57 [1] : vector<8x8x8xf32> to vector<8x8xf32>
    %97 = arith.mulf %95, %38 : vector<8x8x8xf32>
    %cst_58 = arith.constant dense<0.000000e+00> : vector<8x8xf32>
    %98 = vector.multi_reduction <add>, %97, %cst_58 [1] : vector<8x8x8xf32> to vector<8x8xf32>
    %99 = tpu.reciprocal %96 {approx = true} : vector<8x8xf32> -> vector<8x8xf32>
    %100 = arith.mulf %98, %99 : vector<8x8xf32>
    %c0_59 = arith.constant 0 : index
    %c0_60 = arith.constant 0 : index
    %101 = vector.load %arg20[%c0_59, %c0_60] : memref<8x16xf32, #tpu.memory_space<vmem>>, vector<8x16xf32>
    %cst_61 = arith.constant dense<0.000000e+00> : vector<8x16xf32>
    %102 = tpu.matmul %100, %101, %cst_61 {dimension_numbers = #tpu.dot_dimension_numbers<[1], [0], [0], [1], [0, 0, 1, 1], [], []>, precision = #tpu.contract_precision<fp32>} : vector<8x8xf32>, vector<8x16xf32>, vector<8x16xf32> -> vector<8x16xf32>
    %c0_62 = arith.constant 0 : index
    %c0_63 = arith.constant 0 : index
    %103 = vector.load %arg21[%c0_62, %c0_63] : memref<8x16xf32, #tpu.memory_space<vmem>>, vector<8x16xf32>
    %cst_64 = arith.constant dense<0.000000e+00> : vector<8x16xf32>
    %104 = tpu.matmul %79, %103, %cst_64 {dimension_numbers = #tpu.dot_dimension_numbers<[1], [0], [0], [1], [0, 0, 1, 1], [], []>, precision = #tpu.contract_precision<fp32>} : vector<8x8xf32>, vector<8x16xf32>, vector<8x16xf32> -> vector<8x16xf32>
    %105 = arith.addf %102, %104 : vector<8x16xf32>
    %c0_65 = arith.constant 0 : index
    %c0_66 = arith.constant 0 : index
    %106 = vector.load %arg22[%c0_65, %c0_66] : memref<1x16xf32, #tpu.memory_space<vmem>>, vector<1x16xf32>
    %107 = vector.broadcast %106 : vector<1x16xf32> to vector<8x16xf32>
    %108 = arith.addf %105, %107 : vector<8x16xf32>
    %cst_67 = arith.constant 0.000000e+00 : f32
    %109 = vector.broadcast %cst_67 : f32 to vector<8x16xf32>
    %110 = arith.maximumf %108, %109 : vector<8x16xf32>
    %c0_68 = arith.constant 0 : index
    %c0_69 = arith.constant 0 : index
    %111 = vector.load %arg23[%c0_68, %c0_69] : memref<16x32xf32, #tpu.memory_space<vmem>>, vector<16x32xf32>
    %cst_70 = arith.constant dense<0.000000e+00> : vector<8x32xf32>
    %112 = tpu.matmul %110, %111, %cst_70 {dimension_numbers = #tpu.dot_dimension_numbers<[1], [0], [0], [1], [0, 0, 1, 1], [], []>, precision = #tpu.contract_precision<fp32>} : vector<8x16xf32>, vector<16x32xf32>, vector<8x32xf32> -> vector<8x32xf32>
    %c0_71 = arith.constant 0 : index
    %c0_72 = arith.constant 0 : index
    %113 = vector.load %arg24[%c0_71, %c0_72] : memref<1x32xf32, #tpu.memory_space<vmem>>, vector<1x32xf32>
    %114 = vector.broadcast %113 : vector<1x32xf32> to vector<8x32xf32>
    %115 = arith.addf %112, %114 : vector<8x32xf32>
    %c0_73 = arith.constant 0 : index
    %c0_74 = arith.constant 0 : index
    %116 = vector.load %arg25[%c0_73, %c0_74] : memref<8x32xf32, #tpu.memory_space<vmem>>, vector<8x32xf32>
    %cst_75 = arith.constant dense<0.000000e+00> : vector<8x32xf32>
    %117 = tpu.matmul %5, %116, %cst_75 {dimension_numbers = #tpu.dot_dimension_numbers<[1], [0], [0], [1], [0, 0, 1, 1], [], []>, precision = #tpu.contract_precision<fp32>} : vector<8x8xf32>, vector<8x32xf32>, vector<8x32xf32> -> vector<8x32xf32>
    %c0_76 = arith.constant 0 : index
    %c0_77 = arith.constant 0 : index
    %118 = vector.load %arg26[%c0_76, %c0_77] : memref<1x32xf32, #tpu.memory_space<vmem>>, vector<1x32xf32>
    %119 = vector.broadcast %118 : vector<1x32xf32> to vector<8x32xf32>
    %120 = arith.addf %117, %119 : vector<8x32xf32>
    %121 = arith.addf %115, %120 : vector<8x32xf32>
    %cst_78 = arith.constant 0.000000e+00 : f32
    %122 = vector.broadcast %cst_78 : f32 to vector<8x32xf32>
    %123 = arith.cmpf oge, %121, %122 : vector<8x32xf32>
    %cst_79 = arith.constant 0.00999999977 : f32
    %124 = vector.broadcast %cst_79 : f32 to vector<8x32xf32>
    %125 = arith.mulf %124, %121 : vector<8x32xf32>
    %126 = arith.select %123, %121, %125 : vector<8x32xi1>, vector<8x32xf32>
    %c0_80 = arith.constant 0 : index
    %c0_81 = arith.constant 0 : index
    %c0_82 = arith.constant 0 : index
    %127 = vector.load %arg27[%c0_80, %c0_81, %c0_82] : memref<1x8x32xf32, #tpu.memory_space<vmem>>, vector<1x8x32xf32>
    %128 = vector.shape_cast %127 : vector<1x8x32xf32> to vector<8x32xf32>
    %129 = vector.shape_cast %126 : vector<8x32xf32> to vector<1x8x32xf32>
    tpu.vector_store %arg27[%c0_80, %c0_81, %c0_82], %129 {strides = array<i32>} : memref<1x8x32xf32, #tpu.memory_space<vmem>>, vector<1x8x32xf32>,
    return
  }
  func.func @transform_0(%arg0: i32, %arg1: i32) -> (i32, i32, i32) {
    %c0_i32 = arith.constant 0 : i32
    %c0_i32_0 = arith.constant 0 : i32
    %c0_i32_1 = arith.constant 0 : i32
    return %arg0, %c0_i32, %c0_i32_0 : i32, i32, i32
  }
  func.func @transform_1(%arg0: i32, %arg1: i32) -> (i32, i32, i32) {
    %c0_i32 = arith.constant 0 : i32
    %c0_i32_0 = arith.constant 0 : i32
    return %arg0, %arg1, %c0_i32 : i32, i32, i32
  }
  func.func @transform_2(%arg0: i32, %arg1: i32) -> (i32, i32, i32) {
    %c0_i32 = arith.constant 0 : i32
    %c0_i32_0 = arith.constant 0 : i32
    return %arg0, %arg1, %c0_i32 : i32, i32, i32
  }
  func.func @transform_3(%arg0: i32, %arg1: i32) -> (i32, i32, i32) {
    %c0_i32 = arith.constant 0 : i32
    %c0_i32_0 = arith.constant 0 : i32
    return %arg0, %arg1, %c0_i32 : i32, i32, i32
  }
  func.func @transform_4(%arg0: i32, %arg1: i32) -> (i32, i32, i32) {
    %c0_i32 = arith.constant 0 : i32
    %c0_i32_0 = arith.constant 0 : i32
    return %arg0, %arg1, %c0_i32 : i32, i32, i32
  }
  func.func @transform_5(%arg0: i32, %arg1: i32) -> (i32, i32) {
    %c0_i32 = arith.constant 0 : i32
    %c0_i32_0 = arith.constant 0 : i32
    %c0_i32_1 = arith.constant 0 : i32
    return %c0_i32, %c0_i32_0 : i32, i32
  }
  func.func @transform_6(%arg0: i32, %arg1: i32) -> (i32, i32) {
    %c0_i32 = arith.constant 0 : i32
    %c0_i32_0 = arith.constant 0 : i32
    %c0_i32_1 = arith.constant 0 : i32
    return %c0_i32, %c0_i32_0 : i32, i32
  }
  func.func @transform_7(%arg0: i32, %arg1: i32) -> (i32, i32) {
    %c0_i32 = arith.constant 0 : i32
    %c0_i32_0 = arith.constant 0 : i32
    %c0_i32_1 = arith.constant 0 : i32
    return %c0_i32, %c0_i32_0 : i32, i32
  }
  func.func @transform_8(%arg0: i32, %arg1: i32) -> (i32, i32) {
    %c0_i32 = arith.constant 0 : i32
    %c0_i32_0 = arith.constant 0 : i32
    %c0_i32_1 = arith.constant 0 : i32
    return %c0_i32, %c0_i32_0 : i32, i32
  }
  func.func @transform_9(%arg0: i32, %arg1: i32) -> (i32, i32) {
    %c0_i32 = arith.constant 0 : i32
    %c0_i32_0 = arith.constant 0 : i32
    %c0_i32_1 = arith.constant 0 : i32
    return %c0_i32, %c0_i32_0 : i32, i32
  }
  func.func @transform_10(%arg0: i32, %arg1: i32) -> (i32, i32) {
    %c0_i32 = arith.constant 0 : i32
    %c0_i32_0 = arith.constant 0 : i32
    %c0_i32_1 = arith.constant 0 : i32
    return %c0_i32, %c0_i32_0 : i32, i32
  }
  func.func @transform_11(%arg0: i32, %arg1: i32) -> (i32, i32) {
    %c0_i32 = arith.constant 0 : i32
    %c0_i32_0 = arith.constant 0 : i32
    %c0_i32_1 = arith.constant 0 : i32
    return %c0_i32, %c0_i32_0 : i32, i32
  }
  func.func @transform_12(%arg0: i32, %arg1: i32) -> (i32, i32) {
    %c0_i32 = arith.constant 0 : i32
    %c0_i32_0 = arith.constant 0 : i32
    %c0_i32_1 = arith.constant 0 : i32
    return %c0_i32, %c0_i32_0 : i32, i32
  }
  func.func @transform_13(%arg0: i32, %arg1: i32) -> (i32, i32) {
    %c0_i32 = arith.constant 0 : i32
    %c0_i32_0 = arith.constant 0 : i32
    %c0_i32_1 = arith.constant 0 : i32
    return %c0_i32, %c0_i32_0 : i32, i32
  }
  func.func @transform_14(%arg0: i32, %arg1: i32) -> (i32, i32) {
    %c0_i32 = arith.constant 0 : i32
    %c0_i32_0 = arith.constant 0 : i32
    %c0_i32_1 = arith.constant 0 : i32
    return %c0_i32, %c0_i32_0 : i32, i32
  }
  func.func @transform_15(%arg0: i32, %arg1: i32) -> (i32, i32) {
    %c0_i32 = arith.constant 0 : i32
    %c0_i32_0 = arith.constant 0 : i32
    %c0_i32_1 = arith.constant 0 : i32
    return %c0_i32, %c0_i32_0 : i32, i32
  }
  func.func @transform_16(%arg0: i32, %arg1: i32) -> (i32, i32) {
    %c0_i32 = arith.constant 0 : i32
    %c0_i32_0 = arith.constant 0 : i32
    %c0_i32_1 = arith.constant 0 : i32
    return %c0_i32, %c0_i32_0 : i32, i32
  }
  func.func @transform_17(%arg0: i32, %arg1: i32) -> (i32, i32) {
    %c0_i32 = arith.constant 0 : i32
    %c0_i32_0 = arith.constant 0 : i32
    %c0_i32_1 = arith.constant 0 : i32
    return %c0_i32, %c0_i32_0 : i32, i32
  }
  func.func @transform_18(%arg0: i32, %arg1: i32) -> (i32, i32) {
    %c0_i32 = arith.constant 0 : i32
    %c0_i32_0 = arith.constant 0 : i32
    %c0_i32_1 = arith.constant 0 : i32
    return %c0_i32, %c0_i32_0 : i32, i32
  }
  func.func @transform_19(%arg0: i32, %arg1: i32) -> (i32, i32) {
    %c0_i32 = arith.constant 0 : i32
    %c0_i32_0 = arith.constant 0 : i32
    %c0_i32_1 = arith.constant 0 : i32
    return %c0_i32, %c0_i32_0 : i32, i32
  }
  func.func @transform_20(%arg0: i32, %arg1: i32) -> (i32, i32) {
    %c0_i32 = arith.constant 0 : i32
    %c0_i32_0 = arith.constant 0 : i32
    %c0_i32_1 = arith.constant 0 : i32
    return %c0_i32, %c0_i32_0 : i32, i32
  }
  func.func @transform_21(%arg0: i32, %arg1: i32) -> (i32, i32) {
    %c0_i32 = arith.constant 0 : i32
    %c0_i32_0 = arith.constant 0 : i32
    %c0_i32_1 = arith.constant 0 : i32
    return %c0_i32, %c0_i32_0 : i32, i32
  }
  func.func @transform_22(%arg0: i32, %arg1: i32) -> (i32, i32) {
    %c0_i32 = arith.constant 0 : i32
    %c0_i32_0 = arith.constant 0 : i32
    %c0_i32_1 = arith.constant 0 : i32
    return %c0_i32, %c0_i32_0 : i32, i32
  }
  func.func @transform_23(%arg0: i32, %arg1: i32) -> (i32, i32) {
    %c0_i32 = arith.constant 0 : i32
    %c0_i32_0 = arith.constant 0 : i32
    %c0_i32_1 = arith.constant 0 : i32
    return %c0_i32, %c0_i32_0 : i32, i32
  }
  func.func @transform_24(%arg0: i32, %arg1: i32) -> (i32, i32) {
    %c0_i32 = arith.constant 0 : i32
    %c0_i32_0 = arith.constant 0 : i32
    %c0_i32_1 = arith.constant 0 : i32
    return %c0_i32, %c0_i32_0 : i32, i32
  }
  func.func @transform_25(%arg0: i32, %arg1: i32) -> (i32, i32, i32) {
    %c0_i32 = arith.constant 0 : i32
    %c0_i32_0 = arith.constant 0 : i32
    return %arg0, %arg1, %c0_i32 : i32, i32, i32
  }
}

</mosaic_0001>

<bundles_post_ra>
// kernel: tpu_custom_call.1
= control target key start
LH: loop header
LB: loop body
LE: loop exit
PB: predicated region body
PF: predicated region fallthrough
CT: control target
= control target key end

     0   :  { %s9277_s0 = inlined_call_operand.vmem [shape: f32[2,16,3], index: 0, kind: input, shape index: {}]   ;;  %s9278_s1 = inlined_call_operand.vmem [shape: f32[2,16,3], index: 1, kind: input, shape index: {}]   ;;  %s9279_s2 = inlined_call_operand.vmem [shape: f32[2,16,8], index: 2, kind: input, shape index: {}]   ;;  %s9280_s3 = inlined_call_operand.vmem [shape: s32[2,128,1], index: 3, kind: input, shape index: {}]   ;;  %s9281_s4 = inlined_call_operand.vmem [shape: f32[2,128,1], index: 4, kind: input, shape index: {}]   ;;  %s9282_s5 = inlined_call_operand.vmem [shape: f32[8,8], index: 5, kind: input, shape index: {}]   ;;  %s9283_s6 = inlined_call_operand.vmem [shape: f32[1,8], index: 6, kind: input, shape index: {}]   ;;  %s9284_s7 = inlined_call_operand.vmem [shape: f32[3,16], index: 7, kind: input, shape index: {}]   ;;  %s9285_s8 = inlined_call_operand.vmem [shape: f32[3,16], index: 8, kind: input, shape index: {}]   ;;  %s9286_s9 = inlined_call_operand.vmem [shape: f32[1,16], index: 9, kind: input, shape index: {}]   ;;  %s9287_s10 = inlined_call_operand.vmem [shape: f32[1,16], index: 10, kind: input, shape index: {}]   ;;  %s9288_s11 = inlined_call_operand.vmem [shape: f32[8,8], index: 11, kind: input, shape index: {}]   ;;  %s9289_s12 = inlined_call_operand.vmem [shape: f32[8,8], index: 12, kind: input, shape index: {}]   ;;  %s9290_s13 = inlined_call_operand.vmem [shape: f32[8,8], index: 13, kind: input, shape index: {}]   ;;  %s9291_s14 = inlined_call_operand.vmem [shape: f32[8,8], index: 14, kind: input, shape index: {}]   ;;  %s9292_s15 = inlined_call_operand.vmem [shape: f32[1,8], index: 15, kind: input, shape index: {}]   ;;  %s9293_s16 = inlined_call_operand.vmem [shape: f32[8,8], index: 16, kind: input, shape index: {}]   ;;  %s9294_s17 = inlined_call_operand.vmem [shape: f32[8,8], index: 17, kind: input, shape index: {}]   ;;  %s9295_s18 = inlined_call_operand.vmem [shape: f32[8,16], index: 18, kind: input, shape index: {}]   ;;  %s9296_s19 = inlined_call_operand.vmem [shape: f32[8,16], index: 19, kind: input, shape index: {}]   ;;  %s9297_s20 = inlined_call_operand.vmem [shape: f32[1,16], index: 20, kind: input, shape index: {}]   ;;  %s9298_s21 = inlined_call_operand.vmem [shape: f32[16,32], index: 21, kind: input, shape index: {}]   ;;  %s9299_s22 = inlined_call_operand.vmem [shape: f32[1,32], index: 22, kind: input, shape index: {}]   ;;  %s9300_s23 = inlined_call_operand.vmem [shape: f32[8,32], index: 23, kind: input, shape index: {}]   ;;  %s9301_s24 = inlined_call_operand.vmem [shape: f32[1,32], index: 24, kind: input, shape index: {}]   ;;  %s9302_s25 = inlined_call_operand.hbm [shape: f32[2,16,32], index: 25, kind: output, shape index: {}]  }
   0x1   :  { %9312 = sst [smem:[#allocation11_spill]] %s9277_s0 }
   0x2   :  { %9313 = sst [smem:[#allocation12_spill]] %s9278_s1 }
   0x3   :  { %9314 = sst [smem:[#allocation13_spill]] %s9279_s2 }
   0x4   :  { %9315 = sst [smem:[#allocation14_spill]] %s9280_s3 }
   0x5   :  { %9316 = sst [smem:[#allocation15_spill]] %s9281_s4 }
   0x6   :  { %9317 = sst [smem:[#allocation16_spill]] %s9282_s5 }
   0x7   :  { %9318 = sst [smem:[#allocation17_spill]] %s9283_s6 }
   0x8   :  { %9319 = sst [smem:[#allocation18_spill]] %s9284_s7 }
   0x9   :  { %9320 = sst [smem:[#allocation19_spill]] %s9285_s8 }
   0xa   :  { %9321 = sst [smem:[#allocation20_spill]] %s9286_s9 }
   0xb   :  { %9322 = sst [smem:[#allocation21_spill]] %s9287_s10 }
   0xc   :  { %9323 = sst [smem:[#allocation22_spill]] %s9288_s11 }
   0xd   :  { %9324 = sst [smem:[#allocation23_spill]] %s9289_s12 }
   0xe   :  { %9325 = sst [smem:[#allocation24_spill]] %s9290_s13 }
   0xf   :  { %9326 = sst [smem:[#allocation25_spill]] %s9291_s14 }
  0x10   :  { %9327 = sst [smem:[#allocation26_spill]] %s9301_s24 }
  0x11   :  { %9328 = sst [smem:[#allocation27_spill]] %s9302_s25 }
  0x12   :  { %30 = vsyncpa [#allocation3], 0 }
  0x13   :  { %32 = vsyncpa [#allocation3 + $0x1], 0  ;;  %s8391_s29 = smov 0   ;;  %s8393_s2 = smov 0  }
  0x14   :  { %s8395_s6 = smov 0   ;;  %s8397_s30 = smov 0  }
  0x15   :  { %s8399_s7 = smov 0   ;;  %s8401_s3 = smov 0  }
  0x16   :  { %s8403_s26 = smov 0   ;;  %s8405_s1 = smov 0  }
  0x17 LB: > { %9329 = sst [smem:[#allocation5_spill]] %s8224_s29  ;;  %s7335_s8 = sadd.s32 4294967295, %s8252_s1   ;;  %s8252_s1 = sphi %s8405_s1, %s38_s1   ;;  %s8248_s26 = sphi %s8403_s26, %s9360_s26   ;;  %s8244_s3 = sphi %s8401_s3, %s9359_s3   ;;  %s8240_s7 = sphi %s8399_s7, %s9358_s7   ;;  %s8236_s30 = sphi %s8397_s30, %s9357_s30   ;;  %s8232_s6 = sphi %s8395_s6, %s9363_s6   ;;  %s8228_s2 = sphi %s8393_s2, %s9362_s2   ;;  %s8224_s29 = sphi %s8391_s29, %s9361_s29  }
  0x18   : > { %9330 = sst [smem:[#allocation6_spill]] %s8244_s3  ;;  %s7336_s27 = sadd.s32 4294967294, %s8252_s1  }
  0x19   : > { %9331 = sst [smem:[#allocation7_spill]] %s8248_s26  ;;  %s47_s4 = sadd.s32 1, %s8244_s3 }
  0x1a   : > { %p48_p0 = scmp.ge.s32.totalorder %s47_s4, 2  ;;  %s50_s28 = sadd.s32 1, %s8248_s26 }
  0x1b   : > { %p627_p1 = scmp.ne.s32.totalorder %s8232_s6, %s8228_s2  ;;  %p628_p2 = scmp.eq.s32.totalorder %s7335_s8, 3 }
  0x1c   : > { %s9365_s4 = smov (%p48_p0, %s47_s4), 0  ;;  %s9367_s28 = smov (!%p48_p0, %s50_s28), %s8248_s26 }
  0x1d   : > { %9332 = sst [smem:[#allocation8_spill]] %s9365_s4  ;;  %s613_s9 = ssub.s32 %s8244_s3, %s9365_s4 }
  0x1e   : > { %p8442_p3 = por %p628_p2, %p627_p1  ;;  %p52_p4 = scmp.ge.s32.totalorder %s9367_s28, 2 }
  0x1f   : > { %p633_p5 = scmp.ne.s32.totalorder %s8228_s2, %s8224_s29  ;;  %p634_p6 = scmp.eq.s32.totalorder %s7336_s27, 3 }
  0x20   : > { %s9333_s5 = scalar_select %p8442_p3, 1, 0 }
  0x21   : > { %p7339_p7 = scmp.ge.s32.totalorder %s8252_s1, 1  ;;  %s9369_s28 = smov (%p52_p4, %s9367_s28), 0 }
  0x22   : > { %9334 = sst [smem:[#allocation9_spill]] %s9333_s5  ;;  %p8451_p8 = por %p634_p6, %p633_p5 }
  0x23   : > { %9335 = sst [smem:[#allocation10_spill]] %s9369_s28  ;;  %p768_p9 = scmp.lt.s32.totalorder %s8252_s1, 5 }
  0x24   : > { %s612_s8 = ssub.s32 %s8248_s26, %s9369_s28  ;;  %s617_s25 = sadd.s32 1, %s8232_s6 }
  0x25   : > { %s614_s24 = sor.u32 %s613_s9, %s612_s8  ;;  %p769_p10 = pnand %p7339_p7, %p768_p9 }
  0x26   : > { %p615_p11 = scmp.eq.s32.totalorder %s614_s24, 0  ;;  %s9337_s27 = sld [smem:[#allocation19_spill]] (!%p769_p10)  ;;  %vm994_vm0 = vcmask (!%p769_p10), 1042432   ;;  %v8254_v4 = vmov (!%p769_p10), 0   ;;  %v8255_v6 = vmov (!%p769_p10), 0.0   ;;  %vm8256_vm1 = vmmov (!%p769_p10), 0  }
  0x27   : > { %772 = sbr.rel (%p769_p10) target bundleno = 2094 (0x82e), region = 120  ;;  %p870_p12 = scmp.lt.s32.totalorder (!%p769_p10), %s8240_s7, 1  ;;  %8092 = vset.pattern.permute.xlu0 (!%p769_p10), %v8254_v4  ;;  %8093 = vset.pattern.permute.xlu1 (!%p769_p10), %v8254_v4  ;;  %vm987_vm2 = vcmask (!%p769_p10), 23552   ;;  %v932_v53 = vlaneseq (!%p769_p10)  ;;  %vm1996_vm5 = vcmask (!%p769_p10), 130048   ;;  %vm2203_vm6 = vcmask (!%p769_p10), 64512  }
  0x28   : > { %s8460_s4 = scalar_select %p615_p11, %s8232_s6, %s617_s25  }
  0x29   : > { %s7347_s5 = sshll.u32 (!%p769_p10), %s8236_s30, 3  ;;  %s9338_s9 = sld [smem:[#allocation18_spill]] (!%p769_p10)  ;;  %7575 = vmatprep.subr.mxu1 (!%p769_p10), %v8255_v6  ;;  %7577 = vmatprep.mubr.msk.f32.mxu1 (!%p769_p10), %vm8256_vm1, %v8255_v6  ;;  %v933_v54 = vand.u32 (!%p769_p10), 127, %v932_v53  ;;  %vm2674_vm13 = vcmask (!%p769_p10), 1043456   ;;  %vm3963_vm15 = vcmask (!%p769_p10), 1041409  }
  0x2a   : > { %p894_p13 = scmp.lt.s32.totalorder (!%p769_p10), %s7347_s5, 15  ;;  %s9339_s26 = sld [smem:[#allocation11_spill]] (!%p769_p10) }
  0x2b   : > { %p877_p0 = scmp.lt.s32.totalorder (!%p769_p10), %s8236_s30, 1  ;;  %s9343_s29 = sld [smem:[#allocation15_spill]] (!%p769_p10) }
  0x2c   : > { %v986_v0 = vld [vmem:[%s9337_s27] sm:$0x7] (!%p769_p10)  ;;  %s9346_s11 = sld [smem:[#allocation22_spill]] (!%p769_p10)  ;;  %s9348_s10 = sld [smem:[#allocation21_spill]] (!%p769_p10) }
  0x2d   : > { %v996_v1 = vsel (!%p769_p10), %vm994_vm0, %v986_v0, 0  ;;  %s9349_s14 = sld [smem:[#allocation25_spill]] (!%p769_p10)  ;;  %s9350_s12 = sld [smem:[#allocation23_spill]] (!%p769_p10) }
  0x2e   : > { %v8470_v3 = vand.u32 4294901760, %v996_v1  ;;  %s8473_s24 = scalar_select %p870_p12, %s8240_s7, 1 }
  0x2f   : > { %v1488_v2 = vld [vmem:[%s9338_s9] sm:$0x7]  ;;  %s9371_s5 = smov (!%p894_p13, %s7347_s5), 15  ;;  %s9352_s13 = sld [smem:[#allocation24_spill]] }
  0x30   : > { %v1493_v5 = vsel %vm994_vm0, %v1488_v2, 0  ;;  %7545 = vmatprep.subr.mxu0 %v8470_v3  ;;  %s7385_s25 = sshll.u32 %s8473_s24, 4  ;;  %v8483_v8 = vsub.f32 %v996_v1, %v8470_v3  ;;  %s7343_s9 = sshll.u32 %s8473_s24, 1  ;;  %vm3965_vm0 = vcmask 1042434  }
  0x31   : > { %v8476_v7 = vand.u32 4294901760, %v1493_v5  ;;  %7546 = vmatpush3.msra.mxu0 %v8470_v3  ;;  %s874_s28 = scalar_lea.vmem %s9339_s26, %s7385_s25  ;;  %s8489_s8 = sadd.s32 %s7385_s25, %s9371_s5 }
  0x32   : > { %s9311_s27 = sshll.u32 %s8489_s8, 3  ;;  %v912_v9 = vld [vmem:[%s874_s28] sm:$0xff]  ;;  %v913_v10 = vld [vmem:[%s874_s28 + $0x8] sm:$0xff]  ;;  %v8494_v11 = vand.u32 4294901760, %v8483_v8  ;;  %s9340_s5 = sld [smem:[#allocation14_spill]] }
  0x33   : > { %7576 = vmatpush3.msra.mxu1 %v8476_v7  ;;  %v989_v12 = vsel %vm987_vm2, %v912_v9, 0  ;;  %v992_v13 = vsel %vm987_vm2, %v913_v10, 0  ;;  %s878_s24 = scalar_select %p877_p0, %s8236_s30, 1  ;;  %v8526_v24 = vsub.f32 %v1493_v5, %v8476_v7 }
  0x34   : > { %7580 = vmatprep.subr.mxu1 %v8255_v6  ;;  %v8508_v14 = vand.u32 4294901760, %v989_v12  ;;  %v8510_v15 = vand.u32 4294901760, %v992_v13  ;;  %v1088_v16 = vsub.f32 %v8483_v8, %v8494_v11 }
  0x35   : > { %s8528_s26 = sadd.s32 %s7343_s9, %s878_s24  ;;  %v1574_v33 = vand.u32 4294901760, %v8526_v24  ;;  %s8260_s24 = smov [#allocation2]  }
  0x36   : > { %v8518_v19 = vsub.f32 %v989_v12, %v8508_v14  ;;  %v8521_v20 = vsub.f32 %v992_v13, %v8510_v15  ;;  %v1089_v21 = vand.u32 4294901760, %v1088_v16  ;;  %s7344_s28 = sshll.u32 %s8528_s26, 3  ;;  %s9345_s26 = sld [smem:[#allocation16_spill]] }
  0x37   : > { %v1575_v39 = vsub.f32 %v8526_v24, %v1574_v33 }
  0x38   : > { %s8504_s25 = scalar_lea.vmem %s9340_s5, %s9311_s27  ;;  %v1066_v25 = vand.u32 4294901760, %v8518_v19  ;;  %v1076_v26 = vand.u32 4294901760, %v8521_v20  ;;  %7550 = vmatprep.subr.mxu0 %v1089_v21  ;;  %s9341_s5 = sld [smem:[#allocation12_spill]] }
  0x39   : > { %v916_v17 = vld [vmem:[%s8504_s25] sm:$0xff]  ;;  %v918_v18 = vld [vmem:[%s8504_s25 + $0x10] sm:$0xff]  ;;  %v917_v22 = vld [vmem:[%s8504_s25 + $0x8] sm:$0xff]  ;;  %v1576_v44 = vand.u32 4294901760, %v1575_v39 }
  0x3a   : > { %935 = vperm.xlu0 %8092, %v916_v17   ;;  %941 = vperm.xlu1 %8093, %v918_v18   ;;  %v919_v23 = vld [vmem:[%s8504_s25 + $0x18] sm:$0xff]  ;;  %v1067_v28 = vsub.f32 %v8518_v19, %v1066_v25  ;;  %v1077_v29 = vsub.f32 %v8521_v20, %v1076_v26  ;;  %v920_v30 = vld [vmem:[%s8504_s25 + $0x20] sm:$0xff]  ;;  %v921_v31 = vld [vmem:[%s8504_s25 + $0x28] sm:$0xff] }
  0x3b   : > { %v922_v38 = vld [vmem:[%s8504_s25 + $0x30] sm:$0xff]  ;;  %v923_v40 = vld [vmem:[%s8504_s25 + $0x38] sm:$0xff]  ;;  %s9347_s25 = sld [smem:[#allocation20_spill]] }
  0x3c   : > { %v1068_v35 = vand.u32 4294901760, %v1067_v28  ;;  %v1078_v36 = vand.u32 4294901760, %v1077_v29  ;;  %v2195_v5 = vld [vmem:[%s9345_s26] sm:$0xff]  ;;  %s8258_s26 = smov 120  }
  0x3d   : > { %v2208_v12 = vand.u32 4294901760, %v2195_v5 }
  0x3e   : > { %s882_s27 = scalar_lea.vmem %s9341_s5, %s7344_s28  ;;  %938 = vperm.xlu0 %8092, %v917_v22   ;;  %944 = vperm.xlu1 %8093, %v919_v23   ;;  %s9344_s5 = sld [smem:[#allocation13_spill]] }
  0x3f   : > { %v914_v27 = vld [vmem:[%s882_s27] sm:$0xff]  ;;  %7547 = vmatprep.mubr.f32.mxu0 %v1068_v35  ;;  %s9342_s27 = sshll.u32 %s8489_s8, 3 }
  0x40   : > { %v1490_v32 = vsel %vm987_vm2, %v914_v27, 0  ;;  %s8556_s3 = scalar_lea.vmem %s9343_s29, %s9342_s27  ;;  %7548 = vmatmul.mubr.f32.vlgmr.msra.gmra.mrb[0].mxu0 %v1078_v36  ;;  %vm3967_vm2 = vcmask 1043459  }
  0x41   : > { %v8546_v34 = vand.u32 4294901760, %v1490_v32  ;;  %7551 = vmatpush3.msra.mxu0 %v1089_v21  ;;  %7552 = vmatprep.mubr.f32.mxu0 %v8508_v14  ;;  %v928_v43 = vld [vmem:[%s8556_s3 + $0x20] sm:$0xff]  ;;  %v929_v45 = vld [vmem:[%s8556_s3 + $0x28] sm:$0xff]  ;;  %v930_v47 = vld [vmem:[%s8556_s3 + $0x30] sm:$0xff] }
  0x42   : > { %947 = vperm.xlu0 %8092, %v920_v30   ;;  %950 = vperm.xlu1 %8093, %v921_v31   ;;  %v931_v48 = vld [vmem:[%s8556_s3 + $0x38] sm:$0xff]  ;;  %v924_v49 = vld [vmem:[%s8556_s3] sm:$0xff]  ;;  %v925_v50 = vld [vmem:[%s8556_s3 + $0x8] sm:$0xff] }
  0x43   : > { %v1562_v37 = vsub.f32 %v1490_v32, %v8546_v34  ;;  %7555 = vmatprep.subr.mxu0 %v8483_v8  ;;  %v926_v51 = vld [vmem:[%s8556_s3 + $0x10] sm:$0xff]  ;;  %v927_v52 = vld [vmem:[%s8556_s3 + $0x18] sm:$0xff]  ;;  %v2656_v30 = vld [vmem:[%s9346_s11] sm:$0xff]  ;;  %s7381_s3 = sshll.u32 %s8240_s7, 1 }
  0x44   : > { %s890_s27 = scalar_lea.vmem %s9344_s5, %s7344_s28  ;;  %v2661_v31 = vpack.c.bf16 %v2656_v30, %v2656_v30  ;;  %s867_s5 = sand.u32 1, %s8228_s2  }
  0x45   : > { %v1563_v41 = vand.u32 4294901760, %v1562_v37  ;;  %v915_v62 = vld [vmem:[%s890_s27] sm:$0xff]  ;;  %s9353_s28 = sld [smem:[#allocation26_spill]]  ;;  %s7340_s29 = sshll.u32 %s867_s5, 3 }
  0x46   : > { %953 = vperm.xlu0 %8092, %v922_v38   ;;  %956 = vperm.xlu1 %8093, %v923_v40   ;;  %v2205_v2 = vsel %vm2203_vm6, %v915_v62, 0  ;;  %v2676_v32 = vsel %vm2674_vm13, %v2661_v31, 0  ;;  %s7187_s8 = sadd.s32 %s8236_s30, %s7381_s3  ;;  %s869_s11 = scalar_lea.vmem [#allocation2], %s7340_s29 }
  0x47   : > { %v1564_v42 = vsub.f32 %v1562_v37, %v1563_v41  ;;  %v8620_v9 = vand.u32 4294901760, %v2205_v2  ;;  %s7176_s30 = scalar_lea.sflag [#allocation3], %s867_s5 }
  0x48   : > { %7553 = vmatmul.mubr.f32.vlgmr.msra.gmra.mrb[0].mxu0 %v8510_v15 }
  0x49   : > { %v1565_v46 = vand.u32 4294901760, %v1564_v42  ;;  %7556 = vmatpush3.msra.mxu0 %v8483_v8  ;;  %7557 = vmatprep.mubr.f32.mxu0 %v8518_v19  ;;  %v8628_v19 = vsub.f32 %v2205_v2, %v8620_v9  ;;  %v7366_v2 = vld [vmem:[%s9348_s10] ss:$0 sm:$0xff]  ;;  %s7382_s10 = sshll.u32 %s7187_s8, 7 }
  0x4a   : > { %1964 = vperm.xlu0 %8092, %v928_v43   ;;  %1969 = vperm.xlu1 %8093, %v929_v45  }
  0x4b   : > { %7578 = vmatmul.mubr.f32.vlgmr.msra.gmra.mrb[0].mxu1 %v1565_v46  ;;  %7560 = vmatprep.subr.mxu0 %v8470_v3  ;;  %v8636_v23 = vand.u32 4294901760, %v8628_v19 }
  0x4c   : > { %7581 = vmatpush3.msra.mxu1 %v1576_v44  ;;  %7582 = vmatprep.mubr.msk.f32.mxu1 %vm8256_vm1, %v8255_v6 }
  0x4d   : > { %7585 = vmatprep.subr.mxu1 %v8255_v6 }
  0x4e   : > { %1974 = vperm.xlu0 %8092, %v930_v47   ;;  %1979 = vperm.xlu1 %8093, %v931_v48  }
  0x50   : > { %7558 = vmatmul.mubr.f32.vlgmr.msra.gmra.mrb[0].mxu0 %v8521_v20  ;;  %v2285_v20 = vsub.f32 %v2195_v5, %v2208_v12 }
  0x51   : > { %7561 = vmatpush3.msra.mxu0 %v8470_v3  ;;  %7562 = vmatprep.mubr.f32.mxu0 %v1066_v25 }
  0x52   : > { %1944 = vperm.xlu0 %8092, %v924_v49   ;;  %1949 = vperm.xlu1 %8093, %v925_v50   ;;  %v7361_v50 = vld [vmem:[%s9347_s25] ss:$0 sm:$0xff]  ;;  %s9351_s25 = sld [smem:[#allocation17_spill]] }
  0x53   : > { %7583 = vmatmul.mubr.f32.vlgmr.msra.gmra.mrb[0].mxu1 %v8546_v34  ;;  %7565 = vmatprep.subr.mxu0 %v8494_v11 }
  0x54   : > { %7586 = vmatpush3.msra.mxu1 %v8526_v24  ;;  %7587 = vmatprep.mubr.msk.f32.mxu1 %vm8256_vm1, %v8255_v6  ;;  %v2286_v24 = vand.u32 4294901760, %v2285_v20 }
  0x55   : > { %7590 = vmatprep.subr.mxu1 %v8255_v6 }
  0x56   : > { %1954 = vperm.xlu0 %8092, %v926_v51   ;;  %1959 = vperm.xlu1 %8093, %v927_v52   ;;  %v2287_v27 = vsub.f32 %v2285_v20, %v2286_v24 }
  0x58   : > { %7563 = vmatmul.mubr.f32.vlgmr.msra.gmra.mrb[0].mxu0 %v1076_v26  ;;  %v2276_v26 = vsub.f32 %v8628_v19, %v8636_v23  ;;  %v2288_v29 = vand.u32 4294901760, %v2287_v27 }
  0x59   : > { %7566 = vmatpush3.msra.mxu0 %v8494_v11  ;;  %7567 = vmatprep.mubr.f32.mxu0 %v8508_v14 }
  0x5a   : > { %7570 = vmatprep.subr.mxu0 %v8470_v3  ;;  %v8643_v28 = vand.u32 4294901760, %v2276_v26 }
  0x5b   : > { %7588 = vmatmul.mubr.f32.vlgmr.msra.gmra.mrb[0].mxu1 %v1562_v37  ;;  %v2080_v37 = vshrl.u32 %v932_v53, 7 }
  0x5c   : > { %7591 = vmatpush3.msra.mxu1 %v8476_v7  ;;  %7592 = vmatprep.mubr.msk.f32.mxu1 %vm8256_vm1, %v8255_v6 }
  0x5d   : > { %7595 = vmatprep.subr.mxu1 %v8255_v6  ;;  %v8686_v53 = vsub.s32 0, %v2080_v37 }
  0x60   : > { %7568 = vmatmul.mubr.f32.vlgmr.msra.gmra.mrb[0].mxu0 %v8510_v15 }
  0x61   : > { %7571 = vmatpush3.msra.mxu0 %v8470_v3  ;;  %7572 = vmatprep.mubr.f32.mxu0 %v8508_v14 }
  0x62   : > { %8012 = vmatprep.subr.msk.bf16.mxu0 %vm2674_vm13, %v2661_v31 }
  0x63   : > { %7593 = vmatmul.mubr.f32.vlgmr.msra.gmra.mrb[0].mxu1 %v1563_v41 }
  0x64   : > { %7596 = vmatpush3.msra.mxu1 %v1574_v33  ;;  %7597 = vmatprep.mubr.msk.f32.mxu1 %vm8256_vm1, %v8255_v6  ;;  %v8257_v33 = vmov 1966171168  }
  0x65   : > { %7600 = vmatprep.subr.mxu1 %v8255_v6 }
  0x68   : > { %7573 = vmatmul.mubr.f32.vlgmr.msra.gmra.mrb[0].mxu0 %v8510_v15 }
  0x69   : > { %7646 = vmatpush3.bf16.msra.mxu0 %v2676_v32 }
  0x6a   : > { %7685 = vmatprep.subr.mxu0 %v8255_v6 }
  0x6b   : > { %7598 = vmatmul.mubr.f32.vlgmr.msra.gmra.mrb[0].mxu1 %v8546_v34 }
  0x6c   : > { %7601 = vmatpush3.msra.mxu1 %v8476_v7  ;;  %7602 = vmatprep.mubr.msk.f32.mxu1 %vm8256_vm1, %v8255_v6 }
  0x73   : > { %7603 = vmatmul.mubr.f32.vlgmr.msra.gmra.mrb[0].mxu1 %v8546_v34  ;;  %v2077_v34 = vunpack.c.l.s4 %v8257_v33 }
  0x75   : > { %v2078_v36 = vunpack.c.0.s8 %v2077_v34 }
  0x77   : > { %v8674_v39 = vsub.s32 %v2078_v36, %v2080_v37 }
  0xb9   : > { %v936_v55 = vpop.permute.xlu0 %935  ;;  %v942_v60 = vpop.permute.xlu1 %941 }
  0xba   : > { %vm958_vm3 = vcmp.eq.s32.totalorder %v936_v55, %v933_v54  ;;  %vm960_vm7 = vcmp.eq.s32.totalorder %v942_v60, %v933_v54 }
  0xbb   : > { %v7353_v56 = vsel %vm958_vm3, 1.0, %v8255_v6  ;;  %v7355_v7 = vsel %vm960_vm7, 1.0, %v8255_v6  ;;  %vm3969_vm3 = vcmask 1044484   ;;  %vm3973_vm7 = vcmask 1046534  }
  0xbd   : > { %v939_v57 = vpop.permute.xlu0 %938  ;;  %v945_v61 = vpop.permute.xlu1 %944 }
  0xbe   : > { %vm959_vm4 = vcmp.eq.s32.totalorder %v939_v57, %v933_v54  ;;  %vm961_vm8 = vcmp.eq.s32.totalorder %v945_v61, %v933_v54 }
  0xbf   : > { %v7354_v58 = vsel %vm959_vm4, 1.0, %v8255_v6  ;;  %v7356_v8 = vsel %vm961_vm8, 1.0, %v8255_v6  ;;  %vm3971_vm4 = vcmask 1045509   ;;  %vm3975_vm8 = vcmask 1047559  }
  0xc0   : > { %v982_v59 = vpack.c.bf16 %v7354_v58, %v7353_v56  ;;  %v983_v13 = vpack.c.bf16 %v7356_v8, %v7355_v7 }
  0xc1   : > { %v948_v63 = vpop.permute.xlu0 %947  ;;  %v951_v0 = vpop.permute.xlu1 %950 }
  0xc2   : > { %7607 = vmatprep.mubr.msk.bf16.mxu1 %vm1996_vm5, %v982_v59  ;;  %vm962_vm9 = vcmp.eq.s32.totalorder %v948_v63, %v933_v54  ;;  %vm963_vm10 = vcmp.eq.s32.totalorder %v951_v0, %v933_v54 }
  0xc3   : > { %v7357_v10 = vsel %vm962_vm9, 1.0, %v8255_v6  ;;  %v7358_v11 = vsel %vm963_vm10, 1.0, %v8255_v6 }
  0xc4   : > { %v984_v16 = vpack.c.bf16 %v7358_v11, %v7357_v10 }
  0xc5   : > { %v954_v14 = vpop.permute.xlu0 %953  ;;  %v957_v17 = vpop.permute.xlu1 %956 }
  0xc6   : > { %vm964_vm11 = vcmp.eq.s32.totalorder %v954_v14, %v933_v54  ;;  %vm965_vm12 = vcmp.eq.s32.totalorder %v957_v17, %v933_v54 }
  0xc7   : > { %v7359_v21 = vsel %vm964_vm11, 1.0, %v8255_v6  ;;  %v7360_v22 = vsel %vm965_vm12, 1.0, %v8255_v6 }
  0xc8   : > { %v985_v25 = vpack.c.bf16 %v7360_v22, %v7359_v21 }
  0xc9   : > { %v1965_v35 = vpop.permute.xlu0 %1964  ;;  %v1970_v38 = vpop.permute.xlu1 %1969 }
  0xca   : > { %v1992_v26 = vmul.f32 %v7361_v50, %v1965_v35  ;;  %v1993_v27 = vmul.f32 %v7361_v50, %v1970_v38 }
  0xcd   : > { %v1975_v40 = vpop.permute.xlu0 %1974  ;;  %v1980_v41 = vpop.permute.xlu1 %1979 }
  0xce   : > { %v1994_v22 = vmul.f32 %v7361_v50, %v1975_v40 }
  0xd1   : > { %v1945_v43 = vpop.permute.xlu0 %1944  ;;  %v1950_v46 = vpop.permute.xlu1 %1949 }
  0xd2   : > { %v1988_v58 = vmul.f32 %v7361_v50, %v1945_v43 }
  0xd5   : > { %v1955_v51 = vpop.permute.xlu0 %1954  ;;  %v1960_v54 = vpop.permute.xlu1 %1959 }
  0xd6   : > { %v1990_v55 = vmul.f32 %v7361_v50, %v1955_v51  ;;  %v1991_v60 = vmul.f32 %v7361_v50, %v1960_v54 }
 0x13b   : > { %v7574_v1 = vpop.f32.mrb[0].mxu0 }
 0x13c   : > { %v1477_v3 = vpop.f32.mrb[1].mxu0 }
 0x13d   : > { %v1487_v4 = vpack.c.bf16 %v7574_v1, %v1477_v3  ;;  %v1989_v1 = vmul.f32 %v7361_v50, %v1950_v46 }
 0x13f   : > { %7605 = vmatprep.subr.bf16.mxu1 %v1487_v4 }
 0x140   : > { %7606 = vmatpush3.bf16.msra.mxu1 %v1487_v4 }
 0x141   : > { %7615 = vmatprep.subr.mxu1 %v8255_v6 }
 0x143   : > { %7608 = vmatmul.mubr.msk.bf16.vlgmr.msra.gmra.mrb[4].mxu1 %vm1996_vm5, %v983_v13 }
 0x144   : > { %7611 = vmatprep.mubr.msk.bf16.mxu1 %vm1996_vm5, %v984_v16  ;;  %7616 = vmatpush3.msra.mxu1 %v2208_v12 }
 0x145   : > { %7620 = vmatprep.subr.mxu1 %v8255_v6 }
 0x146   : > { %v8625_v15 = vpop.f32.mrb[0].mxu1 }
 0x147   : > { %v7604_v18 = vpop.f32.mrb[1].mxu1  ;;  %v2082_v42 = vrot.slane %v8625_v15, %v8674_v39  ;;  %v2075_v44 = vcombine.high %v8625_v15, %v8625_v15 }
 0x149   : > { %v2090_v45 = vcombine.high %v2082_v42, %v2082_v42  ;;  %v2098_v47 = vrot.slane %v2082_v42, %v8674_v39  ;;  %v2089_v48 = vrot.slane %v2075_v44, %v8674_v39 }
 0x14b   : > { %7612 = vmatmul.mubr.msk.bf16.gmra.mrb[8].mxu1 %vm1996_vm5, %v985_v25  ;;  %v2112_v49 = vrot.slane %v2090_v45, %v8674_v39  ;;  %v2120_v52 = vcombine.high %v2098_v47, %v2098_v47  ;;  %v2091_v56 = vcombine.high %v2089_v48, %v2089_v48  ;;  %v2105_v61 = vrot.slane %v2089_v48, %v8674_v39  ;;  %v3508_v48 = vld [vmem:[%s9349_s14] sm:$0xff] }
 0x14c   : > { %7617 = vmatprep.mubr.msk.f32.mxu1 %vm8256_vm1, %v8255_v6  ;;  %v2127_v4 = vrot.slane %v2098_v47, %v8686_v53 }
 0x14d   : > { %v2122_v57 = vcombine.high %v2112_v49, %v2112_v49  ;;  %v2135_v63 = vrot.slane %v2120_v52, %v8686_v53  ;;  %v2119_v7 = vrot.slane %v2091_v56, %v8674_v39  ;;  %v2131_v15 = vrot.slane %v2112_v49, %v8686_v53 }
 0x14e   : > { %v2121_v18 = vcombine.high %v2105_v61, %v2105_v61  ;;  %v2143_v44 = vrot.slane %v2105_v61, %v8686_v53 }
 0x14f   : > { %v2139_v11 = vrot.slane %v2122_v57, %v8686_v53  ;;  %v2123_v25 = vcombine.high %v2119_v7, %v2119_v7  ;;  %v2147_v51 = vrot.slane %v2119_v7, %v8686_v53 }
 0x150   : > { %v2151_v36 = vrot.slane %v2121_v18, %v8686_v53 }
 0x151   : > { %v2155_v45 = vrot.slane %v2123_v25, %v8686_v53 }
 0x153   : > { %7618 = vmatmul.mubr.f32.vlgmr.msra.gmra.mrb[2].mxu1 %v8643_v28 }
 0x154   : > { %7621 = vmatpush3.msra.mxu1 %v2288_v29  ;;  %7622 = vmatprep.mubr.msk.f32.mxu1 %vm8256_vm1, %v8255_v6  ;;  %v1995_v29 = vmul.f32 %v7361_v50, %v1980_v41 }
 0x155   : > { %7625 = vmatprep.subr.mxu1 %v8255_v6 }
 0x15b   : > { %7623 = vmatmul.mubr.f32.vlgmr.msra.gmra.mrb[2].mxu1 %v8620_v9 }
 0x15c   : > { %7626 = vmatpush3.msra.mxu1 %v2285_v20  ;;  %7627 = vmatprep.mubr.msk.f32.mxu1 %vm8256_vm1, %v8255_v6 }
 0x15d   : > { %7630 = vmatprep.subr.mxu1 %v8255_v6 }
 0x163   : > { %7628 = vmatmul.mubr.f32.vlgmr.msra.gmra.mrb[2].mxu1 %v8628_v19 }
 0x164   : > { %7631 = vmatpush3.msra.mxu1 %v2208_v12  ;;  %7632 = vmatprep.mubr.msk.f32.mxu1 %vm8256_vm1, %v8255_v6 }
 0x165   : > { %7635 = vmatprep.subr.mxu1 %v8255_v6 }
 0x16b   : > { %7633 = vmatmul.mubr.f32.vlgmr.msra.gmra.mrb[2].mxu1 %v8636_v23 }
 0x16c   : > { %7636 = vmatpush3.msra.mxu1 %v2286_v24  ;;  %7637 = vmatprep.mubr.msk.f32.mxu1 %vm8256_vm1, %v8255_v6 }
 0x16d   : > { %7640 = vmatprep.subr.mxu1 %v8255_v6 }
 0x173   : > { %7638 = vmatmul.mubr.f32.vlgmr.msra.gmra.mrb[2].mxu1 %v8620_v9 }
 0x174   : > { %7641 = vmatpush3.msra.mxu1 %v2208_v12  ;;  %7642 = vmatprep.mubr.msk.f32.mxu1 %vm8256_vm1, %v8255_v6 }
 0x175   : > { %8013 = vmatprep.subr.msk.bf16.mxu1 %vm2674_vm13, %v2661_v31 }
 0x17b   : > { %7643 = vmatmul.mubr.f32.vlgmr.msra.gmra.mrb[2].mxu1 %v8620_v9 }
 0x17c   : > { %7936 = vmatpush3.bf16.msra.mxu1 %v2676_v32 }
 0x17d   : > { %7655 = vmatprep.subr.mxu1 %v8255_v6 }
 0x216   : > { %v7609_v59 = vpop.f32.mrb[4].mxu1 }
 0x217   : > { %v2052_v62 = vadd.f32 %v7609_v59, %v1990_v55  ;;  %v2043_v0 = vpop.f32.mrb[5].mxu1 }
 0x218   : > { %v2044_v3 = vadd.f32 %v2043_v0, %v1988_v58  ;;  %v7610_v5 = vpop.f32.mrb[6].mxu1  ;;  %v8719_v58 = vand.u32 4294901760, %v3508_v48 }
 0x219   : > { %v2166_v8 = vadd.f32 %v2135_v63, %v2052_v62  ;;  %v2055_v10 = vadd.f32 %v7610_v5, %v1991_v60  ;;  %v2046_v12 = vpop.f32.mrb[7].mxu1  ;;  %v2743_v63 = vld [vmem:[%s9350_s12] sm:$0xff]  ;;  %s7191_s12 = sshll.u32 %s869_s11, 4  ;;  %s9226_s12 = int_to_ptr.vmem [resolvable:$true] %s7191_s12 }
 0x21a   : > { %v2164_v13 = vadd.f32 %v2127_v4, %v2044_v3  ;;  %v2047_v14 = vadd.f32 %v2046_v12, %v1989_v1  ;;  %v8741_v4 = vand.u32 4294901760, %v2743_v63  ;;  %v7367_v5 = vld [vmem:[%s9351_s25] ss:$0 sm:$0xff]  ;;  %v3587_v12 = vsub.f32 %v3508_v48, %v8719_v58  ;;  %s8158_s7 = scalar_lea.vmem %s9226_s12, 128 }
 0x21b   : > { %v2181_v16 = vadd.f32 %v7366_v2, %v2166_v8  ;;  %v2167_v17 = vadd.f32 %v2139_v11, %v2055_v10  ;;  %p8159_p1 = scmp.ne.s32.totalorder %s9226_s12, %s8158_s7 }
 0x21c   : > { %v2179_v20 = vadd.f32 %v7366_v2, %v2164_v13  ;;  %v2165_v21 = vadd.f32 %v2131_v15, %v2047_v14  ;;  %v2825_v11 = vsub.f32 %v2743_v63, %v8741_v4 }
 0x21d   : > { %v2182_v24 = vadd.f32 %v7366_v2, %v2167_v17  ;;  %v8697_v32 = vmax.f32 %v2181_v16, 0.0  ;;  %v3588_v17 = vand.u32 4294901760, %v3587_v12  ;;  %p8160_p2 = pnand %p8159_p1, %p8442_p3 }
 0x21e   : > { %v2180_v30 = vadd.f32 %v7366_v2, %v2165_v21  ;;  %v7613_v31 = vpop.f32.mrb[8].mxu1  ;;  %v8702_v42 = vmax.f32 %v2179_v20, 0.0  ;;  %v2826_v16 = vand.u32 4294901760, %v2825_v11 }
 0x21f   : > { %v8699_v33 = vmax.f32 %v2182_v24, 0.0  ;;  %v2068_v34 = vadd.f32 %v7613_v31, %v1994_v22  ;;  %v2059_v37 = vpop.f32.mrb[9].mxu1  ;;  %v3589_v22 = vsub.f32 %v3587_v12, %v3588_v17  ;;  %p8161_p4 = pneg %p8160_p2 }
 0x220   : > { %v8704_v43 = vmax.f32 %v2180_v30, 0.0  ;;  %v2060_v40 = vadd.f32 %v2059_v37, %v1992_v26  ;;  %v7614_v35 = vpop.f32.mrb[10].mxu1  ;;  %v2827_v21 = vsub.f32 %v2825_v11, %v2826_v16 }
 0x221   : > { %v2170_v38 = vadd.f32 %v2151_v36, %v2068_v34  ;;  %v2071_v41 = vadd.f32 %v7614_v35, %v1995_v29  ;;  %v2062_v46 = vpop.f32.mrb[11].mxu1  ;;  %v2658_v47 = vpack.c.bf16 %v8699_v33, %v8697_v32 }
 0x222   : > { %v2168_v49 = vadd.f32 %v2143_v44, %v2060_v40  ;;  %v2063_v50 = vadd.f32 %v2062_v46, %v1993_v27  ;;  %v2657_v52 = vpack.c.bf16 %v8704_v43, %v8702_v42  ;;  %v2828_v26 = vand.u32 4294901760, %v2827_v21 }
 0x223   : > { %v2185_v54 = vadd.f32 %v7366_v2, %v2170_v38  ;;  %v2171_v55 = vadd.f32 %v2155_v45, %v2071_v41  ;;  %4442 = vrot.lane.b32.xlu1 %v2658_v47, %s8258_s26  ;;  %v3590_v27 = vand.u32 4294901760, %v3589_v22  ;;  %v3507_v38 = vld [vmem:[%s9352_s13] sm:$0xff]  ;;  %s9355_s13 = sld [smem:[#allocation27_spill]] }
 0x224   : > { %v2183_v56 = vadd.f32 %v7366_v2, %v2168_v49  ;;  %v2169_v57 = vadd.f32 %v2147_v51, %v2063_v50  ;;  %4440 = vrot.lane.b32.xlu0 %v2657_v52, %s8258_s26  ;;  %7647 = vmatprep.mubr.msk.bf16.mxu0 %vm2203_vm6, %v2657_v52  ;;  %v8816_v41 = vand.u32 4294901760, %v3507_v38 }
 0x225   : > { %v2186_v59 = vadd.f32 %v7366_v2, %v2171_v55  ;;  %7648 = vmatmul.mubr.msk.bf16.vlgmr.msra.gmra.mrb[4].mxu0 %vm2203_vm6, %v2658_v47  ;;  %v8725_v61 = vmax.f32 %v2185_v54, 0.0 }
 0x226   : > { %v2184_v60 = vadd.f32 %v7366_v2, %v2169_v57  ;;  %7686 = vmatpush3.msra.mxu0 %v8719_v58  ;;  %7687 = vmatprep.mubr.msk.f32.mxu0 %vm8256_vm1, %v8255_v6  ;;  %v8733_v0 = vmax.f32 %v2183_v56, 0.0  ;;  %v8819_v45 = vsub.f32 %v3507_v38, %v8816_v41 }
 0x227   : > { %v8727_v62 = vmax.f32 %v2186_v59, 0.0  ;;  %7690 = vmatprep.subr.mxu0 %v8255_v6 }
 0x228   : > { %v8735_v1 = vmax.f32 %v2184_v60, 0.0  ;;  %v4058_v46 = vand.u32 4294901760, %v8819_v45 }
 0x229   : > { %v2660_v2 = vpack.c.bf16 %v8727_v62, %v8725_v61  ;;  %s9224_s14 = scalar_lea.hbm %s9355_s13, %s7382_s10 }
 0x22a   : > { %v2659_v3 = vpack.c.bf16 %v8735_v1, %v8733_v0  ;;  %v4059_v47 = vsub.f32 %v8819_v45, %v4058_v46 }
 0x22b   : > { %4446 = vrot.lane.b32.xlu1 %v2660_v2, %s8258_s26 }
 0x22c   : > { %7651 = vmatprep.mubr.msk.bf16.mxu1 %vm2203_vm6, %v2659_v3  ;;  %4444 = vrot.lane.b32.xlu0 %v2659_v3, %s8258_s26  ;;  %v4060_v48 = vand.u32 4294901760, %v4059_v47 }
 0x22d   : > { %7652 = vmatmul.mubr.msk.bf16.vlgmr.msra.gmra.mrb[12].mxu1 %vm2203_vm6, %v2660_v2 }
 0x22e   : > { %7656 = vmatpush3.msra.mxu1 %v8741_v4  ;;  %7657 = vmatprep.mubr.msk.f32.mxu1 %vm8256_vm1, %v8255_v6 }
 0x22f   : > { %5222 = vrot.lane.b32.xlu1 %v8704_v43, %s8258_s26  ;;  %7660 = vmatprep.subr.mxu1 %v8255_v6 }
 0x230   : > { %5220 = vrot.lane.b32.xlu0 %v8702_v42, %s8258_s26 }
 0x233   : > { %5226 = vrot.lane.b32.xlu1 %v8699_v33, %s8258_s26 }
 0x234   : > { %5224 = vrot.lane.b32.xlu0 %v8697_v32, %s8258_s26 }
 0x237   : > { %5230 = vrot.lane.b32.xlu1 %v8735_v1, %s8258_s26 }
 0x238   : > { %5228 = vrot.lane.b32.xlu0 %v8733_v0, %s8258_s26 }
 0x23b   : > { %5234 = vrot.lane.b32.xlu1 %v8727_v62, %s8258_s26 }
 0x23c   : > { %5232 = vrot.lane.b32.xlu0 %v8725_v61, %s8258_s26  ;;  %s8162_s26 = sshll.u32 %s8260_s24, 4  ;;  %s8163_s26 = int_to_ptr.vmem [resolvable:$false] %s8162_s26 }
 0x23d   : > { %p8165_p5 = scmp.lt.s32.totalorder %s9226_s12, %s8163_s26 }
 0x24e   : > { %v2649_v7 = vpop.f32.mrb[2].mxu1 }
 0x24f   : > { %v7937_v8 = vadd.f32 %v7367_v5, %v2649_v7  ;;  %v7644_v10 = vpop.f32.mrb[3].mxu1 }
 0x251   : > { %vm2653_vm14 = vcmp.ge.f32.partialorder %v7937_v8, 0.0  ;;  %v2654_v13 = vmul.f32 0.2, %v7937_v8 }
 0x253   : > { %v2655_v14 = vsel %vm2653_vm14, %v7937_v8, %v2654_v13 }
 0x254   : > { %v2745_v15 = vsel %vm2203_vm6, %v2655_v14, 0 }
 0x255   : > { %v2813_v18 = vand.u32 4294901760, %v2745_v15 }
 0x257   : > { %v2814_v20 = vsub.f32 %v2745_v15, %v2813_v18 }
 0x259   : > { %v2815_v24 = vand.u32 4294901760, %v2814_v20 }
 0x25b   : > { %v2816_v25 = vsub.f32 %v2814_v20, %v2815_v24 }
 0x25d   : > { %v2817_v29 = vand.u32 4294901760, %v2816_v25 }
 0x25f   : > { %7658 = vmatmul.mubr.f32.vlgmr.msra.gmra.mrb[16].mxu1 %v2817_v29  ;;  %7688 = vmatmul.mubr.f32.vlgmr.msra.gmra.mrb[2].mxu0 %v2817_v29 }
 0x260   : > { %7661 = vmatpush3.msra.mxu1 %v2828_v26  ;;  %7691 = vmatpush3.msra.mxu0 %v3590_v27 }
 0x261   : > { %7692 = vmatprep.mubr.msk.f32.mxu0 %vm8256_vm1, %v8255_v6  ;;  %7695 = vmatprep.subr.mxu0 %v8255_v6 }
 0x262   : > { %7662 = vmatprep.mubr.msk.f32.mxu1 %vm8256_vm1, %v8255_v6  ;;  %7665 = vmatprep.subr.mxu1 %v8255_v6 }
 0x263   : > { %7693 = vmatmul.mubr.f32.vlgmr.msra.gmra.mrb[8].mxu0 %v2813_v18 }
 0x264   : > { %7696 = vmatpush3.msra.mxu0 %v3587_v12  ;;  %7697 = vmatprep.mubr.msk.f32.mxu0 %vm8256_vm1, %v8255_v6 }
 0x265   : > { %7700 = vmatprep.subr.mxu0 %v8255_v6 }
 0x267   : > { %7663 = vmatmul.mubr.f32.vlgmr.msra.gmra.mrb[16].mxu1 %v2813_v18  ;;  %7698 = vmatmul.mubr.f32.vlgmr.msra.gmra.mrb[10].mxu0 %v2814_v20 }
 0x268   : > { %7666 = vmatpush3.msra.mxu1 %v2825_v11  ;;  %7701 = vmatpush3.msra.mxu0 %v8719_v58 }
 0x269   : > { %7702 = vmatprep.mubr.msk.f32.mxu0 %vm8256_vm1, %v8255_v6  ;;  %7705 = vmatprep.subr.mxu0 %v8255_v6 }
 0x26a   : > { %7667 = vmatprep.mubr.msk.f32.mxu1 %vm8256_vm1, %v8255_v6  ;;  %7670 = vmatprep.subr.mxu1 %v8255_v6 }
 0x26b   : > { %7703 = vmatmul.mubr.f32.vlgmr.msra.gmra.mrb[12].mxu0 %v2815_v24 }
 0x26c   : > { %7706 = vmatpush3.msra.mxu0 %v3588_v17  ;;  %7707 = vmatprep.mubr.msk.f32.mxu0 %vm8256_vm1, %v8255_v6 }
 0x26d   : > { %7715 = vmatprep.subr.mxu0 %v8255_v6 }
 0x26f   : > { %7668 = vmatmul.mubr.f32.vlgmr.msra.gmra.mrb[16].mxu1 %v2814_v20  ;;  %7708 = vmatmul.mubr.f32.vlgmr.msra.gmra.mrb[14].mxu0 %v2813_v18 }
 0x270   : > { %7671 = vmatpush3.msra.mxu1 %v8741_v4  ;;  %7672 = vmatprep.mubr.msk.f32.mxu1 %vm8256_vm1, %v8255_v6 }
 0x271   : > { %7675 = vmatprep.subr.mxu1 %v8255_v6  ;;  %7717 = vmatprep.mubr.msk.f32.mxu0 %vm8256_vm1, %v8255_v6 }
 0x272   : > { %7716 = vmatpush3.msra.mxu0 %v8816_v41 }
 0x273   : > { %7725 = vmatprep.subr.mxu0 %v8255_v6 }
 0x277   : > { %7673 = vmatmul.mubr.f32.vlgmr.msra.gmra.mrb[16].mxu1 %v2815_v24 }
 0x278   : > { %7676 = vmatpush3.msra.mxu1 %v2826_v16  ;;  %7677 = vmatprep.mubr.msk.f32.mxu1 %vm8256_vm1, %v8255_v6 }
 0x279   : > { %7680 = vmatprep.subr.mxu1 %v8255_v6 }
 0x27f   : > { %7678 = vmatmul.mubr.f32.vlgmr.msra.gmra.mrb[16].mxu1 %v2813_v18 }
 0x280   : > { %7681 = vmatpush3.msra.mxu1 %v8741_v4  ;;  %7682 = vmatprep.mubr.msk.f32.mxu1 %vm8256_vm1, %v8255_v6 }
 0x281   : > { %7710 = vmatprep.subr.mxu1 %v8255_v6 }
 0x287   : > { %7683 = vmatmul.mubr.f32.vlgmr.msra.gmra.mrb[16].mxu1 %v2813_v18 }
 0x288   : > { %7711 = vmatpush3.msra.mxu1 %v8719_v58  ;;  %7712 = vmatprep.mubr.msk.f32.mxu1 %vm8256_vm1, %v8255_v6 }
 0x289   : > { %7720 = vmatprep.subr.mxu1 %v8255_v6 }
 0x28b   : > { %7713 = vmatmul.mubr.f32.vlgmr.msra.gmra.mrb[18].mxu1 %v2813_v18 }
 0x28c   : > { %7722 = vmatprep.mubr.msk.f32.mxu1 %vm8256_vm1, %v8255_v6  ;;  %7721 = vmatpush3.msra.mxu1 %v4060_v48 }
 0x28d   : > { %7730 = vmatprep.subr.mxu1 %v8255_v6 }
 0x2f8   : > { %v7649_v30 = vpop.f32.mrb[4].mxu0 }
 0x2f9   : > { %v2712_v31 = vpop.f32.mrb[5].mxu0 }
 0x2fa   : > { %v7650_v34 = vpop.f32.mrb[6].mxu0 }
 0x2fb   : > { %v2715_v36 = vpop.f32.mrb[7].mxu0 }
 0x300   : > { %v7653_v37 = vpop.f32.mrb[12].mxu1 }
 0x301   : > { %v2728_v40 = vpop.f32.mrb[13].mxu1 }
 0x302   : > { %v8811_v44 = vpop.f32.mrb[14].mxu1 }
 0x303   : > { %v2731_v35 = vpop.f32.mrb[15].mxu1 }
 0x332   : > { %v3581_v49 = vpop.f32.mrb[2].mxu0 }
 0x333   : > { %v7689_v50 = vpop.f32.mrb[3].mxu0 }
 0x336   : > { %v3657_v51 = vpop.f32.mrb[8].mxu0 }
 0x337   : > { %v3658_v52 = vadd.f32 %v3657_v51, %v3581_v49  ;;  %v7694_v54 = vpop.f32.mrb[9].mxu0 }
 0x33a   : > { %v3731_v55 = vpop.f32.mrb[10].mxu0 }
 0x33b   : > { %v3732_v56 = vadd.f32 %v3731_v55, %v3658_v52  ;;  %v7699_v57 = vpop.f32.mrb[11].mxu0 }
 0x33e   : > { %v3805_v58 = vpop.f32.mrb[12].mxu0 }
 0x33f   : > { %v3806_v59 = vadd.f32 %v3805_v58, %v3732_v56  ;;  %v7704_v60 = vpop.f32.mrb[13].mxu0 }
 0x342   : > { %v3879_v63 = vpop.f32.mrb[14].mxu0 }
 0x343   : > { %v3880_v2 = vadd.f32 %v3879_v63, %v3806_v59  ;;  %v7709_v3 = vpop.f32.mrb[15].mxu0 }
 0x35a   : > { %v3189_v4 = vpop.f32.mrb[16].mxu1 }
 0x35b   : > { %v3194_v5 = vcombine.high %v3189_v4, %v3189_v4  ;;  %v3201_v7 = vrot.slane %v3189_v4, %v8674_v39  ;;  %v7684_v8 = vpop.f32.mrb[17].mxu1 }
 0x35d   : > { %v3208_v10 = vrot.slane %v3194_v5, %v8674_v39  ;;  %v3209_v11 = vcombine.high %v3201_v7, %v3201_v7  ;;  %v3217_v12 = vrot.slane %v3201_v7, %v8674_v39 }
 0x35e   : > { %v3951_v13 = vpop.f32.mrb[18].mxu1 }
 0x35f   : > { %v3210_v14 = vcombine.high %v3208_v10, %v3208_v10  ;;  %v3224_v15 = vrot.slane %v3208_v10, %v8674_v39  ;;  %v3231_v16 = vrot.slane %v3209_v11, %v8674_v39  ;;  %v3239_v17 = vcombine.high %v3217_v12, %v3217_v12  ;;  %v7714_v18 = vpop.f32.mrb[19].mxu1 }
 0x360   : > { %v3246_v20 = vrot.slane %v3217_v12, %v8686_v53  ;;  %v8834_v21 = vadd.f32 %v3951_v13, %v3880_v2 }
 0x361   : > { %v3238_v22 = vrot.slane %v3210_v14, %v8674_v39  ;;  %v3240_v24 = vcombine.high %v3224_v15, %v3224_v15  ;;  %v3241_v25 = vcombine.high %v3231_v16, %v3231_v16  ;;  %v3250_v26 = vrot.slane %v3231_v16, %v8686_v53 }
 0x362   : > { %v3254_v27 = vrot.slane %v3239_v17, %v8686_v53  ;;  %v3262_v29 = vrot.slane %v3224_v15, %v8686_v53  ;;  %v8840_v38 = vadd.f32 %v3246_v20, %v2712_v31 }
 0x363   : > { %v3242_v47 = vcombine.high %v3238_v22, %v3238_v22  ;;  %v3258_v48 = vrot.slane %v3241_v25, %v8686_v53  ;;  %v3266_v49 = vrot.slane %v3238_v22, %v8686_v53  ;;  %v3270_v50 = vrot.slane %v3240_v24, %v8686_v53 }
 0x364   : > { %v8845_v51 = vadd.f32 %v3250_v26, %v2715_v36  ;;  %v8847_v52 = vadd.f32 %v7649_v30, %v3254_v27  ;;  %v8849_v54 = vadd.f32 %v3262_v29, %v2728_v40  ;;  %v3291_v55 = vsel %vm2203_vm6, %v8840_v38, -inf }
 0x365   : > { %v3274_v56 = vrot.slane %v3242_v47, %v8686_v53  ;;  %v8854_v31 = vadd.f32 %v7650_v34, %v3258_v48  ;;  %v8856_v57 = vadd.f32 %v3266_v49, %v2731_v35  ;;  %v8858_v58 = vadd.f32 %v7653_v37, %v3270_v50 }
 0x366   : > { %v3292_v59 = vrot.slane %v3291_v55, 4  ;;  %v3298_v36 = vsel %vm2203_vm6, %v8845_v51, -inf  ;;  %v3305_v30 = vsel %vm2203_vm6, %v8847_v52, -inf  ;;  %v3319_v40 = vsel %vm2203_vm6, %v8849_v54, -inf }
 0x367   : > { %v8867_v60 = vadd.f32 %v8811_v44, %v3274_v56  ;;  %v3299_v63 = vrot.slane %v3298_v36, 4  ;;  %v3306_v34 = vrot.slane %v3305_v30, 4  ;;  %v3312_v35 = vsel %vm2203_vm6, %v8854_v31, -inf }
 0x368   : > { %v3293_v37 = vmax.f32 %v3291_v55, %v3292_v59  ;;  %v3313_v2 = vrot.slane %v3312_v35, 4  ;;  %v3320_v3 = vrot.slane %v3319_v40, 4  ;;  %v3326_v4 = vsel %vm2203_vm6, %v8856_v57, -inf }
 0x369   : > { %v3300_v5 = vmax.f32 %v3298_v36, %v3299_v63  ;;  %v3307_v7 = vmax.f32 %v3305_v30, %v3306_v34  ;;  %v3327_v8 = vrot.slane %v3326_v4, 4  ;;  %v3333_v10 = vsel %vm2203_vm6, %v8858_v58, -inf }
 0x36a   : > { %v3294_v11 = vrot.slane %v3293_v37, 2  ;;  %v3314_v44 = vmax.f32 %v3312_v35, %v3313_v2  ;;  %v3321_v12 = vmax.f32 %v3319_v40, %v3320_v3  ;;  %v3334_v13 = vrot.slane %v3333_v10, 4 }
 0x36b   : > { %v3301_v14 = vrot.slane %v3300_v5, 2  ;;  %v3308_v15 = vrot.slane %v3307_v7, 2  ;;  %v3328_v16 = vmax.f32 %v3326_v4, %v3327_v8  ;;  %v3340_v17 = vsel %vm2203_vm6, %v8867_v60, -inf }
 0x36c   : > { %v3295_v18 = vmax.f32 %v3293_v37, %v3294_v11  ;;  %v3315_v20 = vrot.slane %v3314_v44, 2  ;;  %v3322_v22 = vrot.slane %v3321_v12, 2  ;;  %v3335_v24 = vmax.f32 %v3333_v10, %v3334_v13 }
 0x36d   : > { %v3302_v25 = vmax.f32 %v3300_v5, %v3301_v14  ;;  %v3309_v26 = vmax.f32 %v3307_v7, %v3308_v15  ;;  %v3329_v27 = vrot.slane %v3328_v16, 2  ;;  %v3341_v29 = vrot.slane %v3340_v17, 4 }
 0x36e   : > { %v3296_v47 = vrot.slane %v3295_v18, 1  ;;  %v3316_v48 = vmax.f32 %v3314_v44, %v3315_v20  ;;  %v3323_v49 = vmax.f32 %v3321_v12, %v3322_v22  ;;  %v3336_v50 = vrot.slane %v3335_v24, 2 }
 0x36f   : > { %v3303_v55 = vrot.slane %v3302_v25, 1  ;;  %v3310_v56 = vrot.slane %v3309_v26, 1  ;;  %v3330_v59 = vmax.f32 %v3328_v16, %v3329_v27  ;;  %v3342_v36 = vmax.f32 %v3340_v17, %v3341_v29 }
 0x370   : > { %v3297_v30 = vmax.f32 %v3295_v18, %v3296_v47  ;;  %v3317_v40 = vrot.slane %v3316_v48, 1  ;;  %v3324_v63 = vrot.slane %v3323_v49, 1  ;;  %v3337_v34 = vmax.f32 %v3335_v24, %v3336_v50 }
 0x371   : > { %v3304_v35 = vmax.f32 %v3302_v25, %v3303_v55  ;;  %v3311_v37 = vmax.f32 %v3309_v26, %v3310_v56  ;;  %v3331_v2 = vrot.slane %v3330_v59, 1  ;;  %v3343_v3 = vrot.slane %v3342_v36, 2 }
 0x372   : > { %v3318_v4 = vmax.f32 %v3316_v48, %v3317_v40  ;;  %v3325_v5 = vmax.f32 %v3323_v49, %v3324_v63  ;;  %v3338_v7 = vrot.slane %v3337_v34, 1  ;;  %v3347_v8 = vsub.f32 %v8840_v38, %v3297_v30 }
 0x373   : > { %v3332_v10 = vmax.f32 %v3330_v59, %v3331_v2  ;;  %v3344_v11 = vmax.f32 %v3342_v36, %v3343_v3  ;;  %v3348_v44 = vsub.f32 %v8845_v51, %v3304_v35  ;;  %v3349_v12 = vsub.f32 %v8847_v52, %v3311_v37 }
 0x374   : > { %v3339_v13 = vmax.f32 %v3337_v34, %v3338_v7  ;;  %v3350_v14 = vsub.f32 %v8854_v31, %v3318_v4  ;;  %v3351_v15 = vsub.f32 %v8849_v54, %v3325_v5  ;;  %v3355_v16 = vmul.f32 1.442695, %v3347_v8 }
 0x375   : > { %v3345_v17 = vrot.slane %v3344_v11, 1  ;;  %v3352_v18 = vsub.f32 %v8856_v57, %v3332_v10  ;;  %v3357_v20 = vmul.f32 1.442695, %v3348_v44  ;;  %v3359_v22 = vmul.f32 1.442695, %v3349_v12 }
 0x376   : > { %v3353_v24 = vsub.f32 %v8858_v58, %v3339_v13  ;;  %8094 = vpow2.f32 %v3355_v16  ;;  %v3361_v38 = vmul.f32 1.442695, %v3350_v14  ;;  %v3363_v25 = vmul.f32 1.442695, %v3351_v15 }
 0x377   : > { %v3346_v26 = vmax.f32 %v3344_v11, %v3345_v17  ;;  %8096 = vpow2.f32 %v3357_v20  ;;  %v3365_v51 = vmul.f32 1.442695, %v3352_v18 }
 0x378   : > { %8098 = vpow2.f32 %v3359_v22  ;;  %v3367_v52 = vmul.f32 1.442695, %v3353_v24 }
 0x379   : > { %v3354_v31 = vsub.f32 %v8867_v60, %v3346_v26  ;;  %8100 = vpow2.f32 %v3361_v38 }
 0x37a   : > { %8102 = vpow2.f32 %v3363_v25 }
 0x37b   : > { %8104 = vpow2.f32 %v3365_v51  ;;  %v3369_v54 = vmul.f32 1.442695, %v3354_v31 }
 0x37c   : > { %8106 = vpow2.f32 %v3367_v52 }
 0x37d   : > { %8108 = vpow2.f32 %v3369_v54 }
 0x380   : > { %v8095_v57 = vpop.eup %8094 }
 0x381   : > { %v8097_v27 = vpop.eup %8096  ;;  %v3371_v58 = vsel %vm2203_vm6, %v8095_v57, 0.0  ;;  %v3427_v29 = vmul.f32 %v8095_v57, %v8702_v42 }
 0x382   : > { %v8099_v47 = vpop.eup %8098  ;;  %v3372_v48 = vrot.slane %v3371_v58, 4  ;;  %v3378_v49 = vsel %vm2203_vm6, %v8097_v27, 0.0  ;;  %v3428_v56 = vmul.f32 %v8097_v27, %v8704_v43 }
 0x383   : > { %v8101_v50 = vpop.eup %8100  ;;  %v3379_v55 = vrot.slane %v3378_v49, 4  ;;  %v3385_v60 = vsel %vm2203_vm6, %v8099_v47, 0.0  ;;  %v3429_v59 = vmul.f32 %v8099_v47, %v8697_v32  ;;  %v3435_v34 = vsel %vm2203_vm6, %v3427_v29, 0.0 }
 0x384   : > { %v8103_v36 = vpop.eup %8102  ;;  %v3373_v30 = vadd.f32 %v3372_v48, %v3371_v58  ;;  %v3386_v40 = vrot.slane %v3385_v60, 4  ;;  %v3392_v63 = vsel %vm2203_vm6, %v8101_v50, 0.0  ;;  %v3430_v3 = vmul.f32 %v8101_v50, %v8699_v33 }
 0x385   : > { %v8105_v42 = vpop.eup %8104  ;;  %v3380_v35 = vadd.f32 %v3379_v55, %v3378_v49  ;;  %v3393_v37 = vrot.slane %v3392_v63, 4  ;;  %v3399_v2 = vsel %vm2203_vm6, %v8103_v36, 0.0  ;;  %v3431_v58 = vmul.f32 %v8103_v36, %v8733_v0 }
 0x386   : > { %v8895_v4 = vpop.eup %8106  ;;  %v3374_v5 = vrot.slane %v3373_v30, 2  ;;  %v3387_v43 = vadd.f32 %v3386_v40, %v3385_v60  ;;  %v3400_v7 = vrot.slane %v3399_v2, 4  ;;  %v3406_v32 = vsel %vm2203_vm6, %v8105_v42, 0.0 }
 0x387   : > { %v8898_v8 = vpop.eup %8108  ;;  %v3381_v10 = vrot.slane %v3380_v35, 2  ;;  %v3394_v11 = vadd.f32 %v3393_v37, %v3392_v63  ;;  %v3407_v44 = vrot.slane %v3406_v32, 4  ;;  %v3413_v12 = vsel %vm2203_vm6, %v8895_v4, 0.0 }
 0x388   : > { %v3375_v13 = vadd.f32 %v3374_v5, %v3373_v30  ;;  %v3388_v14 = vrot.slane %v3387_v43, 2  ;;  %v3401_v15 = vadd.f32 %v3400_v7, %v3399_v2  ;;  %v3414_v16 = vrot.slane %v3413_v12, 4 }
 0x389   : > { %v3382_v33 = vadd.f32 %v3381_v10, %v3380_v35  ;;  %v3395_v17 = vrot.slane %v3394_v11, 2  ;;  %v3408_v18 = vadd.f32 %v3407_v44, %v3406_v32  ;;  %v3420_v20 = vsel %vm2203_vm6, %v8898_v8, 0.0 }
 0x38a   : > { %v3376_v22 = vrot.slane %v3375_v13, 1  ;;  %v3389_v24 = vadd.f32 %v3388_v14, %v3387_v43  ;;  %v3402_v38 = vrot.slane %v3401_v15, 2  ;;  %v3415_v25 = vadd.f32 %v3414_v16, %v3413_v12 }
 0x38b   : > { %v3383_v26 = vrot.slane %v3382_v33, 1  ;;  %v3396_v51 = vadd.f32 %v3395_v17, %v3394_v11  ;;  %v3409_v52 = vrot.slane %v3408_v18, 2  ;;  %v3421_v31 = vrot.slane %v3420_v20, 4 }
 0x38c   : > { %v3390_v54 = vrot.slane %v3389_v24, 1  ;;  %v3403_v57 = vadd.f32 %v3402_v38, %v3401_v15  ;;  %v3416_v27 = vrot.slane %v3415_v25, 2  ;;  %v3377_v29 = vadd.f32 %v3376_v22, %v3375_v13 }
 0x38d   : > { %v3384_v47 = vadd.f32 %v3383_v26, %v3382_v33  ;;  %v3397_v48 = vrot.slane %v3396_v51, 1  ;;  %v3410_v49 = vadd.f32 %v3409_v52, %v3408_v18  ;;  %v3422_v30 = vadd.f32 %v3421_v31, %v3420_v20 }
 0x38e   : > { %v3391_v50 = vadd.f32 %v3390_v54, %v3389_v24  ;;  %v3404_v55 = vrot.slane %v3403_v57, 1  ;;  %v3417_v60 = vadd.f32 %v3416_v27, %v3415_v25  ;;  %v3432_v63 = vmul.f32 %v8105_v42, %v8735_v1 }
 0x38f   : > { %v3398_v40 = vadd.f32 %v3397_v48, %v3396_v51  ;;  %v3436_v35 = vrot.slane %v3435_v34, 4  ;;  %v3442_v37 = vsel %vm2203_vm6, %v3428_v56, 0.0  ;;  %v3411_v2 = vrot.slane %v3410_v49, 1 }
 0x390   : > { %v3443_v5 = vrot.slane %v3442_v37, 4  ;;  %v3449_v43 = vsel %vm2203_vm6, %v3429_v59, 0.0  ;;  %v3456_v0 = vsel %vm2203_vm6, %v3430_v3, 0.0  ;;  %v3463_v10 = vsel %vm2203_vm6, %v3431_v58, 0.0 }
 0x391   : > { %v3437_v36 = vadd.f32 %v3436_v35, %v3435_v34  ;;  %v3450_v7 = vrot.slane %v3449_v43, 4  ;;  %v3457_v32 = vrot.slane %v3456_v0, 4  ;;  %v3405_v11 = vadd.f32 %v3404_v55, %v3403_v57 }
 0x392   : > { %v3444_v44 = vadd.f32 %v3443_v5, %v3442_v37  ;;  %v3464_v12 = vrot.slane %v3463_v10, 4  ;;  %8110 = vrcp.f32 %v3377_v29  ;;  %v3412_v14 = vadd.f32 %v3411_v2, %v3410_v49 }
 0x393   : > { %v3438_v13 = vrot.slane %v3437_v36, 2  ;;  %v3451_v1 = vadd.f32 %v3450_v7, %v3449_v43  ;;  %v3458_v42 = vadd.f32 %v3457_v32, %v3456_v0  ;;  %8112 = vrcp.f32 %v3384_v47 }
 0x394   : > { %v3445_v56 = vrot.slane %v3444_v44, 2  ;;  %8114 = vrcp.f32 %v3391_v50  ;;  %v3423_v15 = vrot.slane %v3422_v30, 2  ;;  %v3418_v34 = vrot.slane %v3417_v60, 1 }
 0x395   : > { %v3439_v59 = vadd.f32 %v3438_v13, %v3437_v36  ;;  %v3452_v16 = vrot.slane %v3451_v1, 2  ;;  %8116 = vrcp.f32 %v3398_v40  ;;  %v3433_v17 = vmul.f32 %v8895_v4, %v8725_v61 }
 0x396   : > { %v3446_v3 = vadd.f32 %v3445_v56, %v3444_v44  ;;  %8118 = vrcp.f32 %v3405_v11  ;;  %v3424_v33 = vadd.f32 %v3423_v15, %v3422_v30  ;;  %v3434_v22 = vmul.f32 %v8898_v8, %v8727_v62 }
 0x397   : > { %v3440_v18 = vrot.slane %v3439_v59, 1  ;;  %v3453_v20 = vadd.f32 %v3452_v16, %v3451_v1  ;;  %v3459_v24 = vrot.slane %v3458_v42, 2  ;;  %v3465_v26 = vadd.f32 %v3464_v12, %v3463_v10 }
 0x398   : > { %v3447_v38 = vrot.slane %v3446_v3, 1  ;;  %v3425_v25 = vrot.slane %v3424_v33, 1  ;;  %v3470_v51 = vsel %vm2203_vm6, %v3432_v63, 0.0  ;;  %v3419_v52 = vadd.f32 %v3418_v34, %v3417_v60 }
 0x399   : > { %v3454_v31 = vrot.slane %v3453_v20, 1  ;;  %v3460_v54 = vadd.f32 %v3459_v24, %v3458_v42  ;;  %v3471_v57 = vrot.slane %v3470_v51, 4  ;;  %v3441_v27 = vadd.f32 %v3440_v18, %v3439_v59 }
 0x39a   : > { %v3426_v58 = vadd.f32 %v3425_v25, %v3424_v33  ;;  %v3466_v61 = vrot.slane %v3465_v26, 2  ;;  %v3477_v4 = vsel %vm2203_vm6, %v3433_v17, 0.0  ;;  %v3448_v29 = vadd.f32 %v3447_v38, %v3446_v3 }
 0x39b   : > { %v3461_v47 = vrot.slane %v3460_v54, 1  ;;  %v3472_v62 = vadd.f32 %v3471_v57, %v3470_v51  ;;  %v3478_v8 = vrot.slane %v3477_v4, 4  ;;  %v3455_v49 = vadd.f32 %v3454_v31, %v3453_v20 }
 0x39c   : > { %v8111_v48 = vpop.eup %8110  ;;  %v3467_v50 = vadd.f32 %v3466_v61, %v3465_v26  ;;  %v3484_v55 = vsel %vm2203_vm6, %v3434_v22, 0.0  ;;  %8120 = vrcp.f32 %v3412_v14 }
 0x39d   : > { %v8113_v30 = vpop.eup %8112  ;;  %v3462_v60 = vadd.f32 %v3461_v47, %v3460_v54  ;;  %v3473_v40 = vrot.slane %v3472_v62, 2  ;;  %v3479_v63 = vadd.f32 %v3478_v8, %v3477_v4  ;;  %v3485_v35 = vrot.slane %v3484_v55, 4  ;;  %v4434_v47 = vld [vmem:[%s9293_s16] sm:$0xff]  ;;  %v4441_v8 = vpop.permute.xlu0 %4440 }
 0x39e   : > { %v8115_v37 = vpop.eup %8114  ;;  %v3468_v2 = vrot.slane %v3467_v50, 1  ;;  %8122 = vrcp.f32 %v3419_v52  ;;  %v3499_v5 = vmul.f32 %v8111_v48, %v3441_v27  ;;  %v3500_v43 = vmul.f32 %v8113_v30, %v3448_v29  ;;  %v4443_v48 = vpop.permute.xlu1 %4442 }
 0x39f   : > { %v8117_v0 = vpop.eup %8116  ;;  %v3474_v36 = vadd.f32 %v3473_v40, %v3472_v62  ;;  %v3480_v7 = vrot.slane %v3479_v63, 2  ;;  %v3486_v32 = vadd.f32 %v3485_v35, %v3484_v55  ;;  %8124 = vrcp.f32 %v3426_v58 }
 0x3a0   : > { %v8119_v10 = vpop.eup %8118  ;;  %v3469_v11 = vadd.f32 %v3468_v2, %v3467_v50  ;;  %v3501_v44 = vmul.f32 %v8115_v37, %v3455_v49  ;;  %v3502_v12 = vmul.f32 %v8117_v0, %v3462_v60  ;;  %v3964_v13 = vsel %vm3963_vm15, %v3500_v43, %v3499_v5  ;;  %v5325_v50 = vld [vmem:[%s9296_s19] sm:$0xff] }
 0x3a1   : > { %v3475_v1 = vrot.slane %v3474_v36, 1  ;;  %v3481_v42 = vadd.f32 %v3480_v7, %v3479_v63  ;;  %v3487_v56 = vrot.slane %v3486_v32, 2  ;;  %v4445_v49 = vpop.permute.xlu0 %4444  ;;  %v8963_v30 = vand.u32 4294901760, %v5325_v50 }
 0x3a2   : > { %v3503_v14 = vmul.f32 %v8119_v10, %v3469_v11  ;;  %v3966_v15 = vsel %vm3965_vm0, %v3501_v44, %v3964_v13 }
 0x3a3   : > { %v3482_v59 = vrot.slane %v3481_v42, 1  ;;  %v3488_v16 = vadd.f32 %v3487_v56, %v3486_v32  ;;  %v3968_v34 = vsel %vm3967_vm2, %v3502_v12, %v3966_v15  ;;  %v3476_v33 = vadd.f32 %v3475_v1, %v3474_v36  ;;  %v7372_v1 = vld [vmem:[%s9292_s15] ss:$0 sm:$0xff] }
 0x3a4   : > { %v3970_v3 = vsel %vm3969_vm3, %v3503_v14, %v3968_v34 }
 0x3a5   : > { %v3489_v17 = vrot.slane %v3488_v16, 1  ;;  %v3483_v20 = vadd.f32 %v3482_v59, %v3481_v42  ;;  %v5404_v59 = vsub.f32 %v5325_v50, %v8963_v30 }
 0x3a6   : > { %v8121_v18 = vpop.eup %8120 }
 0x3a7   : > { %v3504_v22 = vmul.f32 %v8121_v18, %v3476_v33  ;;  %v3490_v38 = vadd.f32 %v3489_v17, %v3488_v16  ;;  %v5405_v18 = vand.u32 4294901760, %v5404_v59 }
 0x3a8   : > { %v8123_v24 = vpop.eup %8122 }
 0x3a9   : > { %v8125_v25 = vpop.eup %8124  ;;  %v3505_v26 = vmul.f32 %v8123_v24, %v3483_v20  ;;  %v3972_v51 = vsel %vm3971_vm4, %v3504_v22, %v3970_v3 }
 0x3aa   : > { %v3506_v52 = vmul.f32 %v8125_v25, %v3490_v38 }
 0x3ab   : > { %v3974_v31 = vsel %vm3973_vm7, %v3505_v26, %v3972_v51  ;;  %v5406_v26 = vsub.f32 %v5404_v59, %v5405_v18 }
 0x3ac   : > { %v3976_v54 = vsel %vm3975_vm8, %v3506_v52, %v3974_v31 }
 0x3ad   : > { %v3977_v57 = vsel %vm2203_vm6, %v3976_v54, 0 }
 0x3ae   : > { %v4045_v27 = vand.u32 4294901760, %v3977_v57 }
 0x3b0   : > { %v4046_v58 = vsub.f32 %v3977_v57, %v4045_v27  ;;  %7723 = vmatmul.mubr.f32.vlgmr.msra.gmra.mrb[20].mxu1 %v4045_v27 }
 0x3b1   : > { %7731 = vmatpush3.msra.mxu1 %v8816_v41  ;;  %7732 = vmatprep.mubr.msk.f32.mxu1 %vm8256_vm1, %v8255_v6 }
 0x3b2   : > { %v4047_v61 = vand.u32 4294901760, %v4046_v58  ;;  %7740 = vmatprep.subr.mxu1 %v8255_v6 }
 0x3b4   : > { %7733 = vmatmul.mubr.f32.vlgmr.msra.gmra.mrb[22].mxu1 %v4047_v61  ;;  %v4048_v4 = vsub.f32 %v4046_v58, %v4047_v61  ;;  %v5324_v61 = vld [vmem:[%s9295_s18] sm:$0xff] }
 0x3b5   : > { %7741 = vmatpush3.msra.mxu1 %v8816_v41  ;;  %7742 = vmatprep.mubr.msk.f32.mxu1 %vm8256_vm1, %v8255_v6  ;;  %v4435_v41 = vpack.c.bf16 %v4434_v47, %v4434_v47 }
 0x3b6   : > { %v4049_v29 = vand.u32 4294901760, %v4048_v4  ;;  %7755 = vmatprep.subr.mxu1 %v8255_v6  ;;  %v9033_v4 = vand.u32 4294901760, %v5324_v61 }
 0x3b7   : > { %v4461_v62 = vsel %vm2674_vm13, %v4435_v41, 0 }
 0x3b8   : > { %7718 = vmatmul.mubr.f32.vlgmr.msra.gmra.mrb[16].mxu0 %v4049_v29  ;;  %7743 = vmatmul.mubr.f32.vlgmr.msra.gmra.mrb[24].mxu1 %v4045_v27  ;;  %v9036_v29 = vsub.f32 %v5324_v61, %v9033_v4 }
 0x3b9   : > { %7726 = vmatpush3.msra.mxu0 %v8819_v45  ;;  %7727 = vmatprep.mubr.msk.f32.mxu0 %vm8256_vm1, %v8255_v6  ;;  %v4447_v45 = vpop.permute.xlu1 %4446 }
 0x3ba   : > { %7735 = vmatprep.subr.mxu0 %v8255_v6  ;;  %7757 = vmatprep.mubr.msk.f32.mxu1 %vm8256_vm1, %v8255_v6  ;;  %v5868_v47 = vand.u32 4294901760, %v9036_v29 }
 0x3bc   : > { %7728 = vmatmul.mubr.f32.vlgmr.msra.gmra.mrb[18].mxu0 %v4046_v58 }
 0x3bd   : > { %7736 = vmatpush3.msra.mxu0 %v4058_v46  ;;  %7737 = vmatprep.mubr.msk.f32.mxu0 %vm8256_vm1, %v8255_v6  ;;  %v4528_v46 = vld [vmem:[%s9294_s17] sm:$0xff] }
 0x3be   : > { %8014 = vmatprep.subr.msk.bf16.mxu0 %vm2674_vm13, %v4435_v41  ;;  %v8961_v55 = vand.u32 4294901760, %v4528_v46  ;;  %v5869_v41 = vsub.f32 %v9036_v29, %v5868_v47 }
 0x3c0   : > { %7738 = vmatmul.mubr.f32.vlgmr.msra.gmra.mrb[20].mxu0 %v4045_v27  ;;  %7756 = vmatpush3.msra.mxu1 %v8961_v55  ;;  %v5407_v27 = vand.u32 4294901760, %v5406_v26 }
 0x3c1   : > { %7746 = vmatpush3.bf16.msra.mxu0 %v4461_v62  ;;  %7747 = vmatprep.mubr.msk.bf16.mxu0 %vm2203_vm6, %v4441_v8  ;;  %v5870_v62 = vand.u32 4294901760, %v5869_v41 }
 0x3c2   : > { %7785 = vmatprep.subr.mxu0 %v8255_v6  ;;  %7760 = vmatprep.subr.mxu1 %v8255_v6 }
 0x3c4   : > { %7748 = vmatmul.mubr.msk.bf16.vlgmr.msra.gmra.mrb[24].mxu0 %vm2203_vm6, %v4443_v48 }
 0x3c5   : > { %7751 = vmatprep.mubr.msk.bf16.mxu0 %vm2203_vm6, %v4445_v49  ;;  %7786 = vmatpush3.msra.mxu0 %v8963_v30 }
 0x3c6   : > { %7790 = vmatprep.subr.mxu0 %v8255_v6 }
 0x3cc   : > { %7752 = vmatmul.mubr.msk.bf16.gmra.mrb[28].mxu0 %vm2203_vm6, %v4447_v45 }
 0x3cd   : > { %7787 = vmatprep.mubr.msk.f32.mxu0 %vm8256_vm1, %v8255_v6 }
 0x483   : > { %v4127_v60 = vpop.f32.mrb[20].mxu1 }
 0x484   : > { %v7724_v40 = vpop.f32.mrb[21].mxu1 }
 0x487   : > { %v4275_v63 = vpop.f32.mrb[22].mxu1 }
 0x488   : > { %v7734_v35 = vpop.f32.mrb[23].mxu1 }
 0x48b   : > { %v4051_v37 = vpop.f32.mrb[16].mxu0  ;;  %v4421_v2 = vpop.f32.mrb[24].mxu1 }
 0x48c   : > { %v4052_v5 = vadd.f32 %v4051_v37, %v8834_v21  ;;  %v7719_v43 = vpop.f32.mrb[17].mxu0  ;;  %v7744_v0 = vpop.f32.mrb[25].mxu1  ;;  %v4610_v21 = vsub.f32 %v4528_v46, %v8961_v55 }
 0x48e   : > { %v4128_v36 = vadd.f32 %v4127_v60, %v4052_v5  ;;  %v4611_v17 = vand.u32 4294901760, %v4610_v21 }
 0x48f   : > { %v4201_v7 = vpop.f32.mrb[18].mxu0 }
 0x490   : > { %v4202_v32 = vadd.f32 %v4201_v7, %v4128_v36  ;;  %v7729_v10 = vpop.f32.mrb[19].mxu0  ;;  %v4612_v25 = vsub.f32 %v4610_v21, %v4611_v17 }
 0x492   : > { %v4276_v11 = vadd.f32 %v4275_v63, %v4202_v32  ;;  %v4613_v57 = vand.u32 4294901760, %v4612_v25 }
 0x493   : > { %v4349_v44 = vpop.f32.mrb[20].mxu0 }
 0x494   : > { %v4350_v12 = vadd.f32 %v4349_v44, %v4276_v11  ;;  %v7739_v13 = vpop.f32.mrb[21].mxu0 }
 0x496   : > { %v4422_v42 = vadd.f32 %v4421_v2, %v4350_v12 }
 0x497   : > { %v8973_v56 = vpop.f32.mrb[24].mxu0 }
 0x498   : > { %v4432_v14 = vadd.f32 %v7372_v1, %v4422_v42  ;;  %v8975_v15 = vpop.f32.mrb[25].mxu0 }
 0x499   : > { %v8979_v16 = vpop.f32.mrb[26].mxu0 }
 0x49a   : > { %v4433_v34 = vmax.f32 %v4432_v14, 0.0  ;;  %v8981_v3 = vpop.f32.mrb[27].mxu0 }
 0x49c   : > { %v4530_v33 = vsel %vm2203_vm6, %v4433_v34, 0 }
 0x49d   : > { %v4598_v20 = vand.u32 4294901760, %v4530_v33 }
 0x49f   : > { %v4599_v22 = vsub.f32 %v4530_v33, %v4598_v20  ;;  %v8984_v24 = vpop.f32.mrb[28].mxu0 }
 0x4a0   : > { %v8986_v38 = vpop.f32.mrb[29].mxu0 }
 0x4a1   : > { %v8988_v51 = vpop.f32.mrb[30].mxu0  ;;  %v4600_v52 = vand.u32 4294901760, %v4599_v22 }
 0x4a2   : > { %v8990_v31 = vpop.f32.mrb[31].mxu0 }
 0x4a3   : > { %v4601_v54 = vsub.f32 %v4599_v22, %v4600_v52 }
 0x4a5   : > { %v4602_v58 = vand.u32 4294901760, %v4601_v54 }
 0x4a7   : > { %7758 = vmatmul.mubr.f32.vlgmr.msra.gmra.mrb[26].mxu1 %v4602_v58  ;;  %7788 = vmatmul.mubr.f32.vlgmr.msra.gmra.mrb[22].mxu0 %v4602_v58 }
 0x4a8   : > { %7761 = vmatpush3.msra.mxu1 %v4613_v57  ;;  %7791 = vmatpush3.msra.mxu0 %v5407_v27 }
 0x4a9   : > { %7792 = vmatprep.mubr.msk.f32.mxu0 %vm8256_vm1, %v8255_v6  ;;  %7795 = vmatprep.subr.mxu0 %v8255_v6 }
 0x4aa   : > { %7762 = vmatprep.mubr.msk.f32.mxu1 %vm8256_vm1, %v8255_v6  ;;  %7765 = vmatprep.subr.mxu1 %v8255_v6 }
 0x4ab   : > { %7793 = vmatmul.mubr.f32.vlgmr.msra.gmra.mrb[32].mxu0 %v4598_v20 }
 0x4ac   : > { %7796 = vmatpush3.msra.mxu0 %v5404_v59  ;;  %7797 = vmatprep.mubr.msk.f32.mxu0 %vm8256_vm1, %v8255_v6 }
 0x4ad   : > { %7805 = vmatprep.subr.mxu0 %v8255_v6 }
 0x4af   : > { %7763 = vmatmul.mubr.f32.vlgmr.msra.gmra.mrb[26].mxu1 %v4598_v20  ;;  %7798 = vmatmul.mubr.f32.vlgmr.msra.gmra.mrb[34].mxu0 %v4599_v22 }
 0x4b0   : > { %7766 = vmatpush3.msra.mxu1 %v4610_v21  ;;  %7806 = vmatpush3.msra.mxu0 %v5405_v18 }
 0x4b1   : > { %7807 = vmatprep.mubr.msk.f32.mxu0 %vm8256_vm1, %v8255_v6  ;;  %7767 = vmatprep.mubr.msk.f32.mxu1 %vm8256_vm1, %v8255_v6 }
 0x4b2   : > { %7770 = vmatprep.subr.mxu1 %v8255_v6  ;;  %7815 = vmatprep.subr.mxu0 %v8255_v6 }
 0x4b3   : > { %7808 = vmatmul.mubr.f32.vlgmr.msra.gmra.mrb[36].mxu0 %v4598_v20 }
 0x4b4   : > { %7817 = vmatprep.mubr.msk.f32.mxu0 %vm8256_vm1, %v8255_v6  ;;  %7816 = vmatpush3.msra.mxu0 %v9033_v4 }
 0x4b5   : > { %7825 = vmatprep.subr.mxu0 %v8255_v6 }
 0x4b7   : > { %7768 = vmatmul.mubr.f32.vlgmr.msra.gmra.mrb[26].mxu1 %v4599_v22 }
 0x4b8   : > { %7771 = vmatpush3.msra.mxu1 %v8961_v55  ;;  %7772 = vmatprep.mubr.msk.f32.mxu1 %vm8256_vm1, %v8255_v6 }
 0x4b9   : > { %7775 = vmatprep.subr.mxu1 %v8255_v6 }
 0x4bf   : > { %7773 = vmatmul.mubr.f32.vlgmr.msra.gmra.mrb[26].mxu1 %v4600_v52 }
 0x4c0   : > { %7776 = vmatpush3.msra.mxu1 %v4611_v17  ;;  %7777 = vmatprep.mubr.msk.f32.mxu1 %vm8256_vm1, %v8255_v6 }
 0x4c1   : > { %7780 = vmatprep.subr.mxu1 %v8255_v6 }
 0x4c7   : > { %7778 = vmatmul.mubr.f32.vlgmr.msra.gmra.mrb[26].mxu1 %v4598_v20 }
 0x4c8   : > { %7781 = vmatpush3.msra.mxu1 %v8961_v55  ;;  %7782 = vmatprep.mubr.msk.f32.mxu1 %vm8256_vm1, %v8255_v6 }
 0x4c9   : > { %7800 = vmatprep.subr.mxu1 %v8255_v6 }
 0x4cf   : > { %7783 = vmatmul.mubr.f32.vlgmr.msra.gmra.mrb[26].mxu1 %v4598_v20 }
 0x4d0   : > { %7801 = vmatpush3.msra.mxu1 %v8963_v30  ;;  %7802 = vmatprep.mubr.msk.f32.mxu1 %vm8256_vm1, %v8255_v6 }
 0x4d1   : > { %7810 = vmatprep.subr.mxu1 %v8255_v6 }
 0x4d3   : > { %7803 = vmatmul.mubr.f32.vlgmr.msra.gmra.mrb[28].mxu1 %v4600_v52 }
 0x4d4   : > { %7811 = vmatpush3.msra.mxu1 %v8963_v30  ;;  %7812 = vmatprep.mubr.msk.f32.mxu1 %vm8256_vm1, %v8255_v6 }
 0x4d5   : > { %7820 = vmatprep.subr.mxu1 %v8255_v6 }
 0x4d7   : > { %7813 = vmatmul.mubr.f32.vlgmr.msra.gmra.mrb[30].mxu1 %v4598_v20 }
 0x4d8   : > { %7822 = vmatprep.mubr.msk.f32.mxu1 %vm8256_vm1, %v8255_v6  ;;  %7821 = vmatpush3.msra.mxu1 %v5870_v62 }
 0x4d9   : > { %7830 = vmatprep.subr.mxu1 %v8255_v6 }
 0x57a   : > { %v5398_v8 = vpop.f32.mrb[22].mxu0 }
 0x57b   : > { %v7789_v48 = vpop.f32.mrb[23].mxu0 }
 0x57e   : > { %v5474_v49 = vpop.f32.mrb[32].mxu0 }
 0x57f   : > { %v5475_v45 = vadd.f32 %v5474_v49, %v5398_v8  ;;  %v7794_v46 = vpop.f32.mrb[33].mxu0 }
 0x582   : > { %v5548_v50 = vpop.f32.mrb[34].mxu0 }
 0x583   : > { %v5549_v55 = vadd.f32 %v5548_v50, %v5475_v45  ;;  %v7799_v30 = vpop.f32.mrb[35].mxu0 }
 0x586   : > { %v5696_v60 = vpop.f32.mrb[36].mxu0 }
 0x587   : > { %v7809_v40 = vpop.f32.mrb[37].mxu0 }
 0x5a2   : > { %v4974_v63 = vpop.f32.mrb[26].mxu1 }
 0x5a3   : > { %v4979_v35 = vcombine.high %v4974_v63, %v4974_v63  ;;  %v4986_v37 = vrot.slane %v4974_v63, %v8674_v39  ;;  %v7784_v2 = vpop.f32.mrb[27].mxu1 }
 0x5a5   : > { %v4993_v5 = vrot.slane %v4979_v35, %v8674_v39  ;;  %v4994_v43 = vcombine.high %v4986_v37, %v4986_v37  ;;  %v5002_v0 = vrot.slane %v4986_v37, %v8674_v39 }
 0x5a6   : > { %v5622_v36 = vpop.f32.mrb[28].mxu1 }
 0x5a7   : > { %v4995_v7 = vcombine.high %v4993_v5, %v4993_v5  ;;  %v5009_v32 = vrot.slane %v4993_v5, %v8674_v39  ;;  %v5016_v10 = vrot.slane %v4994_v43, %v8674_v39  ;;  %v5024_v11 = vcombine.high %v5002_v0, %v5002_v0  ;;  %v7804_v44 = vpop.f32.mrb[29].mxu1 }
 0x5a8   : > { %v5031_v12 = vrot.slane %v5002_v0, %v8686_v53  ;;  %v5623_v13 = vadd.f32 %v5622_v36, %v5549_v55 }
 0x5a9   : > { %v5023_v1 = vrot.slane %v4995_v7, %v8674_v39  ;;  %v5025_v42 = vcombine.high %v5009_v32, %v5009_v32  ;;  %v5026_v14 = vcombine.high %v5016_v10, %v5016_v10  ;;  %v5035_v21 = vrot.slane %v5016_v10, %v8686_v53 }
 0x5aa   : > { %v5039_v59 = vrot.slane %v5024_v11, %v8686_v53  ;;  %v5047_v34 = vrot.slane %v5009_v32, %v8686_v53  ;;  %v9056_v33 = vadd.f32 %v5031_v12, %v8975_v15  ;;  %v9058_v17 = vadd.f32 %v5696_v60, %v5623_v13  ;;  %v9060_v18 = vpop.f32.mrb[30].mxu1 }
 0x5ab   : > { %v5027_v20 = vcombine.high %v5023_v1, %v5023_v1  ;;  %v5043_v22 = vrot.slane %v5026_v14, %v8686_v53  ;;  %v5051_v39 = vrot.slane %v5023_v1, %v8686_v53  ;;  %v5055_v25 = vrot.slane %v5025_v42, %v8686_v53  ;;  %v7814_v26 = vpop.f32.mrb[31].mxu1 }
 0x5ac   : > { %v9066_v52 = vadd.f32 %v5035_v21, %v8981_v3  ;;  %v9069_v54 = vadd.f32 %v8973_v56, %v5039_v59  ;;  %v9072_v15 = vadd.f32 %v5047_v34, %v8986_v38  ;;  %v5076_v57 = vsel %vm2203_vm6, %v9056_v33, -inf }
 0x5ad   : > { %v5059_v27 = vrot.slane %v5027_v20, %v8686_v53  ;;  %v9078_v58 = vadd.f32 %v8979_v16, %v5043_v22  ;;  %v9081_v61 = vadd.f32 %v5051_v39, %v8990_v31  ;;  %v9084_v3 = vadd.f32 %v8984_v24, %v5055_v25 }
 0x5ae   : > { %v5077_v41 = vrot.slane %v5076_v57, 4  ;;  %v5083_v56 = vsel %vm2203_vm6, %v9066_v52, -inf  ;;  %v5090_v38 = vsel %vm2203_vm6, %v9069_v54, -inf  ;;  %v5104_v62 = vsel %vm2203_vm6, %v9072_v15, -inf }
 0x5af   : > { %v9093_v53 = vadd.f32 %v8988_v51, %v5059_v27  ;;  %v5084_v16 = vrot.slane %v5083_v56, 4  ;;  %v5091_v8 = vrot.slane %v5090_v38, 4  ;;  %v5097_v31 = vsel %vm2203_vm6, %v9078_v58, -inf }
 0x5b0   : > { %v5078_v24 = vmax.f32 %v5076_v57, %v5077_v41  ;;  %v5098_v48 = vrot.slane %v5097_v31, 4  ;;  %v5105_v49 = vrot.slane %v5104_v62, 4  ;;  %v5111_v45 = vsel %vm2203_vm6, %v9081_v61, -inf }
 0x5b1   : > { %v5085_v46 = vmax.f32 %v5083_v56, %v5084_v16  ;;  %v5092_v50 = vmax.f32 %v5090_v38, %v5091_v8  ;;  %v5112_v55 = vrot.slane %v5111_v45, 4  ;;  %v5118_v30 = vsel %vm2203_vm6, %v9084_v3, -inf }
 0x5b2   : > { %v5079_v60 = vrot.slane %v5078_v24, 2  ;;  %v5099_v51 = vmax.f32 %v5097_v31, %v5098_v48  ;;  %v5106_v40 = vmax.f32 %v5104_v62, %v5105_v49  ;;  %v5119_v63 = vrot.slane %v5118_v30, 4 }
 0x5b3   : > { %v5086_v35 = vrot.slane %v5085_v46, 2  ;;  %v5093_v37 = vrot.slane %v5092_v50, 2  ;;  %v5113_v2 = vmax.f32 %v5111_v45, %v5112_v55  ;;  %v5125_v5 = vsel %vm2203_vm6, %v9093_v53, -inf }
 0x5b4   : > { %v5080_v43 = vmax.f32 %v5078_v24, %v5079_v60  ;;  %v5100_v0 = vrot.slane %v5099_v51, 2  ;;  %v5107_v36 = vrot.slane %v5106_v40, 2  ;;  %v5120_v7 = vmax.f32 %v5118_v30, %v5119_v63 }
 0x5b5   : > { %v5087_v32 = vmax.f32 %v5085_v46, %v5086_v35  ;;  %v5094_v10 = vmax.f32 %v5092_v50, %v5093_v37  ;;  %v5114_v11 = vrot.slane %v5113_v2, 2  ;;  %v5126_v44 = vrot.slane %v5125_v5, 4  ;;  %v5221_v37 = vpop.permute.xlu0 %5220 }
 0x5b6   : > { %v5081_v12 = vrot.slane %v5080_v43, 1  ;;  %v5101_v13 = vmax.f32 %v5099_v51, %v5100_v0  ;;  %v5108_v1 = vmax.f32 %v5106_v40, %v5107_v36  ;;  %v5121_v42 = vrot.slane %v5120_v7, 2 }
 0x5b7   : > { %v5088_v14 = vrot.slane %v5087_v32, 1  ;;  %v5095_v21 = vrot.slane %v5094_v10, 1  ;;  %v5115_v59 = vmax.f32 %v5113_v2, %v5114_v11  ;;  %v5127_v34 = vmax.f32 %v5125_v5, %v5126_v44 }
 0x5b8   : > { %v5082_v20 = vmax.f32 %v5080_v43, %v5081_v12  ;;  %v5102_v22 = vrot.slane %v5101_v13, 1  ;;  %v5109_v39 = vrot.slane %v5108_v1, 1  ;;  %v5122_v25 = vmax.f32 %v5120_v7, %v5121_v42 }
 0x5b9   : > { %v5089_v26 = vmax.f32 %v5087_v32, %v5088_v14  ;;  %v5096_v57 = vmax.f32 %v5094_v10, %v5095_v21  ;;  %v5116_v27 = vrot.slane %v5115_v59, 1  ;;  %v5128_v41 = vrot.slane %v5127_v34, 2 }
 0x5ba   : > { %v5103_v56 = vmax.f32 %v5101_v13, %v5102_v22  ;;  %v5110_v38 = vmax.f32 %v5108_v1, %v5109_v39  ;;  %v5123_v62 = vrot.slane %v5122_v25, 1  ;;  %v5132_v16 = vsub.f32 %v9056_v33, %v5082_v20 }
 0x5bb   : > { %v5117_v8 = vmax.f32 %v5115_v59, %v5116_v27  ;;  %v5129_v31 = vmax.f32 %v5127_v34, %v5128_v41  ;;  %v5133_v24 = vsub.f32 %v9066_v52, %v5089_v26  ;;  %v5134_v48 = vsub.f32 %v9069_v54, %v5096_v57 }
 0x5bc   : > { %v5124_v49 = vmax.f32 %v5122_v25, %v5123_v62  ;;  %v5135_v45 = vsub.f32 %v9078_v58, %v5103_v56  ;;  %v5136_v46 = vsub.f32 %v9072_v15, %v5110_v38  ;;  %v5140_v50 = vmul.f32 1.442695, %v5132_v16 }
 0x5bd   : > { %v5130_v55 = vrot.slane %v5129_v31, 1  ;;  %v5137_v30 = vsub.f32 %v9081_v61, %v5117_v8  ;;  %v5142_v60 = vmul.f32 1.442695, %v5133_v24  ;;  %v5144_v51 = vmul.f32 1.442695, %v5134_v48 }
 0x5be   : > { %v5138_v40 = vsub.f32 %v9084_v3, %v5124_v49  ;;  %8126 = vpow2.f32 %v5140_v50  ;;  %v5146_v33 = vmul.f32 1.442695, %v5135_v45  ;;  %v5148_v63 = vmul.f32 1.442695, %v5136_v46  ;;  %v5223_v3 = vpop.permute.xlu1 %5222 }
 0x5bf   : > { %v5131_v35 = vmax.f32 %v5129_v31, %v5130_v55  ;;  %8128 = vpow2.f32 %v5142_v60  ;;  %v5150_v52 = vmul.f32 1.442695, %v5137_v30  ;;  %v9112_v54 = vadd.f32 %v9060_v18, %v9058_v17  ;;  %v5225_v17 = vpop.permute.xlu0 %5224 }
 0x5c0   : > { %8130 = vpow2.f32 %v5144_v51  ;;  %v5152_v15 = vmul.f32 1.442695, %v5138_v40 }
 0x5c1   : > { %v5139_v58 = vsub.f32 %v9093_v53, %v5131_v35  ;;  %8132 = vpow2.f32 %v5146_v33 }
 0x5c2   : > { %8134 = vpow2.f32 %v5148_v63  ;;  %v5227_v13 = vpop.permute.xlu1 %5226 }
 0x5c3   : > { %8136 = vpow2.f32 %v5150_v52  ;;  %v5154_v61 = vmul.f32 1.442695, %v5139_v58  ;;  %v5229_v33 = vpop.permute.xlu0 %5228 }
 0x5c4   : > { %8138 = vpow2.f32 %v5152_v15 }
 0x5c5   : > { %8140 = vpow2.f32 %v5154_v61 }
 0x5c8   : > { %v8127_v2 = vpop.eup %8126 }
 0x5c9   : > { %v8129_v5 = vpop.eup %8128  ;;  %v5156_v43 = vsel %vm2203_vm6, %v8127_v2, 0.0  ;;  %v5244_v0 = vmul.f32 %v8127_v2, %v5221_v37 }
 0x5ca   : > { %v8131_v36 = vpop.eup %8130  ;;  %v5157_v18 = vrot.slane %v5156_v43, 4  ;;  %v5163_v7 = vsel %vm2203_vm6, %v8129_v5, 0.0  ;;  %v5245_v11 = vmul.f32 %v8129_v5, %v5223_v3 }
 0x5cb   : > { %v8133_v32 = vpop.eup %8132  ;;  %v5164_v53 = vrot.slane %v5163_v7, 4  ;;  %v5170_v10 = vsel %vm2203_vm6, %v8131_v36, 0.0  ;;  %v5246_v44 = vmul.f32 %v8131_v36, %v5225_v17  ;;  %v5252_v21 = vsel %vm2203_vm6, %v5244_v0, 0.0  ;;  %v5231_v36 = vpop.permute.xlu1 %5230 }
 0x5cc   : > { %v8135_v12 = vpop.eup %8134  ;;  %v5158_v1 = vadd.f32 %v5157_v18, %v5156_v43  ;;  %v5171_v42 = vrot.slane %v5170_v10, 4  ;;  %v5177_v14 = vsel %vm2203_vm6, %v8133_v32, 0.0  ;;  %v5247_v39 = vmul.f32 %v8133_v32, %v5227_v13 }
 0x5cd   : > { %v8137_v59 = vpop.eup %8136  ;;  %v5165_v34 = vadd.f32 %v5164_v53, %v5163_v7  ;;  %v5178_v20 = vrot.slane %v5177_v14, 4  ;;  %v5184_v22 = vsel %vm2203_vm6, %v8135_v12, 0.0  ;;  %v5248_v3 = vmul.f32 %v8135_v12, %v5229_v33 }
 0x5ce   : > { %v9121_v25 = vpop.eup %8138  ;;  %v5159_v26 = vrot.slane %v5158_v1, 2  ;;  %v5172_v57 = vadd.f32 %v5171_v42, %v5170_v10  ;;  %v5185_v27 = vrot.slane %v5184_v22, 4  ;;  %v5191_v41 = vsel %vm2203_vm6, %v8137_v59, 0.0 }
 0x5cf   : > { %v9124_v56 = vpop.eup %8140  ;;  %v5166_v38 = vrot.slane %v5165_v34, 2  ;;  %v5179_v62 = vadd.f32 %v5178_v20, %v5177_v14  ;;  %v5192_v16 = vrot.slane %v5191_v41, 4  ;;  %v5198_v8 = vsel %vm2203_vm6, %v9121_v25, 0.0 }
 0x5d0   : > { %v5160_v31 = vadd.f32 %v5159_v26, %v5158_v1  ;;  %v5173_v24 = vrot.slane %v5172_v57, 2  ;;  %v5186_v48 = vadd.f32 %v5185_v27, %v5184_v22  ;;  %v5199_v49 = vrot.slane %v5198_v8, 4 }
 0x5d1   : > { %v5167_v45 = vadd.f32 %v5166_v38, %v5165_v34  ;;  %v5180_v46 = vrot.slane %v5179_v62, 2  ;;  %v5193_v50 = vadd.f32 %v5192_v16, %v5191_v41  ;;  %v5205_v55 = vsel %vm2203_vm6, %v9124_v56, 0.0 }
 0x5d2   : > { %v5161_v30 = vrot.slane %v5160_v31, 1  ;;  %v5174_v60 = vadd.f32 %v5173_v24, %v5172_v57  ;;  %v5187_v51 = vrot.slane %v5186_v48, 2  ;;  %v5200_v40 = vadd.f32 %v5199_v49, %v5198_v8 }
 0x5d3   : > { %v5168_v63 = vrot.slane %v5167_v45, 1  ;;  %v5181_v35 = vadd.f32 %v5180_v46, %v5179_v62  ;;  %v5194_v52 = vrot.slane %v5193_v50, 2  ;;  %v5206_v15 = vrot.slane %v5205_v55, 4 }
 0x5d4   : > { %v5175_v58 = vrot.slane %v5174_v60, 1  ;;  %v5188_v61 = vadd.f32 %v5187_v51, %v5186_v48  ;;  %v5201_v37 = vrot.slane %v5200_v40, 2  ;;  %v5162_v2 = vadd.f32 %v5161_v30, %v5160_v31  ;;  %v5235_v48 = vpop.permute.xlu1 %5234 }
 0x5d5   : > { %v5169_v5 = vadd.f32 %v5168_v63, %v5167_v45  ;;  %v5182_v43 = vrot.slane %v5181_v35, 1  ;;  %v5195_v0 = vadd.f32 %v5194_v52, %v5193_v50  ;;  %v5207_v32 = vadd.f32 %v5206_v15, %v5205_v55 }
 0x5d6   : > { %v5176_v17 = vadd.f32 %v5175_v58, %v5174_v60  ;;  %v5189_v18 = vrot.slane %v5188_v61, 1  ;;  %v5202_v7 = vadd.f32 %v5201_v37, %v5200_v40  ;;  %v5249_v10 = vmul.f32 %v8137_v59, %v5231_v36 }
 0x5d7   : > { %v5183_v53 = vadd.f32 %v5182_v43, %v5181_v35  ;;  %v5253_v13 = vrot.slane %v5252_v21, 4  ;;  %v5259_v1 = vsel %vm2203_vm6, %v5245_v11, 0.0  ;;  %v5196_v42 = vrot.slane %v5195_v0, 1 }
 0x5d8   : > { %v5260_v14 = vrot.slane %v5259_v1, 4  ;;  %v5266_v34 = vsel %vm2203_vm6, %v5246_v44, 0.0  ;;  %v5273_v12 = vsel %vm2203_vm6, %v5247_v39, 0.0  ;;  %v5280_v57 = vsel %vm2203_vm6, %v5248_v3, 0.0  ;;  %v5233_v44 = vpop.permute.xlu0 %5232 }
 0x5d9   : > { %v5254_v20 = vadd.f32 %v5253_v13, %v5252_v21  ;;  %v5267_v22 = vrot.slane %v5266_v34, 4  ;;  %v5274_v26 = vrot.slane %v5273_v12, 4  ;;  %v5190_v27 = vadd.f32 %v5189_v18, %v5188_v61 }
 0x5da   : > { %v5261_v41 = vadd.f32 %v5260_v14, %v5259_v1  ;;  %v5281_v38 = vrot.slane %v5280_v57, 4  ;;  %8142 = vrcp.f32 %v5162_v2  ;;  %v5197_v8 = vadd.f32 %v5196_v42, %v5195_v0 }
 0x5db   : > { %v5255_v62 = vrot.slane %v5254_v20, 2  ;;  %v5268_v59 = vadd.f32 %v5267_v22, %v5266_v34  ;;  %v5275_v16 = vadd.f32 %v5274_v26, %v5273_v12  ;;  %8144 = vrcp.f32 %v5169_v5 }
 0x5dc   : > { %v5262_v11 = vrot.slane %v5261_v41, 2  ;;  %8146 = vrcp.f32 %v5176_v17  ;;  %v5208_v31 = vrot.slane %v5207_v32, 2  ;;  %v5203_v21 = vrot.slane %v5202_v7, 1 }
 0x5dd   : > { %v5256_v24 = vadd.f32 %v5255_v62, %v5254_v20  ;;  %v5269_v39 = vrot.slane %v5268_v59, 2  ;;  %8148 = vrcp.f32 %v5183_v53  ;;  %v5250_v46 = vmul.f32 %v9121_v25, %v5233_v44 }
 0x5de   : > { %v5263_v49 = vadd.f32 %v5262_v11, %v5261_v41  ;;  %8150 = vrcp.f32 %v5190_v27  ;;  %v5209_v45 = vadd.f32 %v5208_v31, %v5207_v32  ;;  %v5251_v30 = vmul.f32 %v9124_v56, %v5235_v48 }
 0x5df   : > { %v5257_v50 = vrot.slane %v5256_v24, 1  ;;  %v5270_v55 = vadd.f32 %v5269_v39, %v5268_v59  ;;  %v5276_v60 = vrot.slane %v5275_v16, 2  ;;  %v5282_v33 = vadd.f32 %v5281_v38, %v5280_v57 }
 0x5e0   : > { %v5264_v51 = vrot.slane %v5263_v49, 1  ;;  %v5210_v40 = vrot.slane %v5209_v45, 1  ;;  %v5287_v63 = vsel %vm2203_vm6, %v5249_v10, 0.0  ;;  %v5204_v35 = vadd.f32 %v5203_v21, %v5202_v7 }
 0x5e1   : > { %v5271_v52 = vrot.slane %v5270_v55, 1  ;;  %v5277_v15 = vadd.f32 %v5276_v60, %v5275_v16  ;;  %v5288_v58 = vrot.slane %v5287_v63, 4  ;;  %v5258_v61 = vadd.f32 %v5257_v50, %v5256_v24 }
 0x5e2   : > { %v5211_v37 = vadd.f32 %v5210_v40, %v5209_v45  ;;  %v5283_v3 = vrot.slane %v5282_v33, 2  ;;  %v5294_v2 = vsel %vm2203_vm6, %v5250_v46, 0.0  ;;  %v5265_v25 = vadd.f32 %v5264_v51, %v5263_v49 }
 0x5e3   : > { %v5278_v5 = vrot.slane %v5277_v15, 1  ;;  %v5289_v43 = vadd.f32 %v5288_v58, %v5287_v63  ;;  %v5295_v0 = vrot.slane %v5294_v2, 4  ;;  %v5272_v36 = vadd.f32 %v5271_v52, %v5270_v55 }
 0x5e4   : > { %v8143_v56 = vpop.eup %8142  ;;  %v5284_v17 = vadd.f32 %v5283_v3, %v5282_v33  ;;  %v5301_v18 = vsel %vm2203_vm6, %v5251_v30, 0.0  ;;  %8152 = vrcp.f32 %v5197_v8 }
 0x5e5   : > { %v8145_v32 = vpop.eup %8144  ;;  %v5279_v7 = vadd.f32 %v5278_v5, %v5277_v15  ;;  %v5290_v53 = vrot.slane %v5289_v43, 2  ;;  %v5296_v10 = vadd.f32 %v5295_v0, %v5294_v2  ;;  %v5302_v13 = vrot.slane %v5301_v18, 4  ;;  %v6245_v2 = vld [vmem:[%s9298_s21 + $0x8] sm:$0xff] }
 0x5e6   : > { %v8147_v1 = vpop.eup %8146  ;;  %v5285_v42 = vrot.slane %v5284_v17, 1  ;;  %8154 = vrcp.f32 %v5204_v35  ;;  %v5316_v14 = vmul.f32 %v8143_v56, %v5258_v61  ;;  %v5317_v34 = vmul.f32 %v8145_v32, %v5265_v25 }
 0x5e7   : > { %v8149_v12 = vpop.eup %8148  ;;  %v5291_v20 = vadd.f32 %v5290_v53, %v5289_v43  ;;  %v5297_v22 = vrot.slane %v5296_v10, 2  ;;  %v5303_v26 = vadd.f32 %v5302_v13, %v5301_v18  ;;  %8156 = vrcp.f32 %v5211_v37 }
 0x5e8   : > { %v8151_v57 = vpop.eup %8150  ;;  %v5286_v27 = vadd.f32 %v5285_v42, %v5284_v17  ;;  %v5318_v41 = vmul.f32 %v8147_v1, %v5272_v36  ;;  %v5319_v38 = vmul.f32 %v8149_v12, %v5279_v7  ;;  %v5780_v62 = vsel %vm3963_vm15, %v5317_v34, %v5316_v14 }
 0x5e9   : > { %v5292_v59 = vrot.slane %v5291_v20, 1  ;;  %v5298_v16 = vadd.f32 %v5297_v22, %v5296_v10  ;;  %v5304_v11 = vrot.slane %v5303_v26, 2  ;;  %v8259_v25 = vmov 0.0|0.0  }
 0x5ea   : > { %v5320_v8 = vmul.f32 %v8151_v57, %v5286_v27  ;;  %v5781_v31 = vsel %vm3965_vm0, %v5318_v41, %v5780_v62 }
 0x5eb   : > { %v5299_v44 = vrot.slane %v5298_v16, 1  ;;  %v5305_v24 = vadd.f32 %v5304_v11, %v5303_v26  ;;  %v5782_v39 = vsel %vm3967_vm2, %v5319_v38, %v5781_v31  ;;  %v5293_v48 = vadd.f32 %v5292_v59, %v5291_v20  ;;  %v7377_v31 = vld [vmem:[%s9297_s20] ss:$0 sm:$0xff] }
 0x5ec   : > { %v5783_v21 = vsel %vm3969_vm3, %v5320_v8, %v5782_v39 }
 0x5ed   : > { %v5306_v49 = vrot.slane %v5305_v24, 1  ;;  %v5300_v46 = vadd.f32 %v5299_v44, %v5298_v16 }
 0x5ee   : > { %v8153_v45 = vpop.eup %8152 }
 0x5ef   : > { %v5321_v50 = vmul.f32 %v8153_v45, %v5293_v48  ;;  %v5307_v30 = vadd.f32 %v5306_v49, %v5305_v24 }
 0x5f0   : > { %v8155_v55 = vpop.eup %8154 }
 0x5f1   : > { %v8157_v60 = vpop.eup %8156  ;;  %v5322_v51 = vmul.f32 %v8155_v55, %v5300_v46  ;;  %v5784_v40 = vsel %vm3971_vm4, %v5321_v50, %v5783_v21  ;;  %v6715_v50 = vld [vmem:[%s9300_s23] sm:$0xff] }
 0x5f2   : > { %v5323_v33 = vmul.f32 %v8157_v60, %v5307_v30  ;;  %v6724_v55 = vand.u32 4294901760, %v6715_v50 }
 0x5f3   : > { %v5785_v63 = vsel %vm3973_vm7, %v5322_v51, %v5784_v40 }
 0x5f4   : > { %v5786_v35 = vsel %vm3975_vm8, %v5323_v33, %v5785_v63  ;;  %v6801_v30 = vsub.f32 %v6715_v50, %v6724_v55 }
 0x5f5   : > { %v5787_v52 = vsel %vm2203_vm6, %v5786_v35, 0 }
 0x5f6   : > { %v5855_v15 = vand.u32 4294901760, %v5787_v52  ;;  %v6802_v60 = vand.u32 4294901760, %v6801_v30 }
 0x5f8   : > { %v5856_v58 = vsub.f32 %v5787_v52, %v5855_v15  ;;  %7823 = vmatmul.mubr.f32.vlgmr.msra.gmra.mrb[32].mxu1 %v5855_v15  ;;  %v6803_v51 = vsub.f32 %v6801_v30, %v6802_v60 }
 0x5f9   : > { %7831 = vmatpush3.msra.mxu1 %v9033_v4  ;;  %7832 = vmatprep.mubr.msk.f32.mxu1 %vm8256_vm1, %v8255_v6 }
 0x5fa   : > { %v5857_v61 = vand.u32 4294901760, %v5856_v58  ;;  %7840 = vmatprep.subr.mxu1 %v8255_v6  ;;  %v6804_v40 = vand.u32 4294901760, %v6803_v51 }
 0x5fc   : > { %7833 = vmatmul.mubr.f32.vlgmr.msra.gmra.mrb[34].mxu1 %v5857_v61  ;;  %v5858_v37 = vsub.f32 %v5856_v58, %v5857_v61 }
 0x5fd   : > { %7841 = vmatpush3.msra.mxu1 %v9033_v4  ;;  %7842 = vmatprep.mubr.msk.f32.mxu1 %vm8256_vm1, %v8255_v6  ;;  %v6244_v4 = vld [vmem:[%s9298_s21] sm:$0xff] }
 0x5fe   : > { %v5859_v3 = vand.u32 4294901760, %v5858_v37  ;;  %v6257_v5 = vand.u32 4294901760, %v6244_v4 }
 0x600   : > { %7818 = vmatmul.mubr.f32.vlgmr.msra.gmra.mrb[38].mxu0 %v5859_v3  ;;  %7843 = vmatmul.mubr.f32.vlgmr.msra.gmra.mrb[36].mxu1 %v5855_v15  ;;  %v6335_v43 = vsub.f32 %v6244_v4, %v6257_v5 }
 0x601   : > { %7826 = vmatpush3.msra.mxu0 %v9036_v29  ;;  %7827 = vmatprep.mubr.msk.f32.mxu0 %vm8256_vm1, %v8255_v6  ;;  %v6260_v29 = vand.u32 4294901760, %v6245_v2 }
 0x602   : > { %7835 = vmatprep.subr.mxu0 %v8255_v6  ;;  %v6336_v56 = vand.u32 4294901760, %v6335_v43 }
 0x603   : > { %v6342_v0 = vsub.f32 %v6245_v2, %v6260_v29 }
 0x604   : > { %7828 = vmatmul.mubr.f32.vlgmr.msra.gmra.mrb[40].mxu0 %v5856_v58  ;;  %v6337_v17 = vsub.f32 %v6335_v43, %v6336_v56 }
 0x605   : > { %7836 = vmatpush3.msra.mxu0 %v5868_v47  ;;  %7837 = vmatprep.mubr.msk.f32.mxu0 %vm8256_vm1, %v8255_v6  ;;  %v7918_v47 = vpack.c.bf16 %v6260_v29, %v6257_v5  ;;  %v6343_v36 = vand.u32 4294901760, %v6342_v0  ;;  %v7924_v10 = vpack.c.bf16 %v6342_v0, %v6335_v43 }
 0x606   : > { %7917 = vmatprep.subr.bf16.mxu0 %v8259_v25  ;;  %v6338_v32 = vand.u32 4294901760, %v6337_v17 }
 0x607   : > { %v6344_v18 = vsub.f32 %v6342_v0, %v6343_v36  ;;  %v7930_v13 = vpack.c.bf16 %v6343_v36, %v6336_v56 }
 0x608   : > { %7838 = vmatmul.mubr.f32.vlgmr.msra.gmra.mrb[42].mxu0 %v5855_v15 }
 0x609   : > { %7849 = vmatprep.mubr.msk.f32.mxu0 %vm8256_vm1, %v8255_v6  ;;  %7919 = vmatpush3.bf16.msra.mxu0 %v7918_v47  ;;  %v6345_v7 = vand.u32 4294901760, %v6344_v18 }
 0x60a   : > { %7920 = vmatprep.subr.bf16.mxu0 %v8259_v25 }
 0x60b   : > { %v7921_v53 = vpack.c.bf16 %v6345_v7, %v6338_v32 }
 0x6cb   : > { %v5937_v1 = vpop.f32.mrb[32].mxu1 }
 0x6cc   : > { %v7824_v42 = vpop.f32.mrb[33].mxu1 }
 0x6cf   : > { %v6085_v14 = vpop.f32.mrb[34].mxu1 }
 0x6d0   : > { %v7834_v34 = vpop.f32.mrb[35].mxu1 }
 0x6d3   : > { %v5861_v12 = vpop.f32.mrb[38].mxu0  ;;  %v6231_v20 = vpop.f32.mrb[36].mxu1 }
 0x6d4   : > { %v5862_v22 = vadd.f32 %v5861_v12, %v9112_v54  ;;  %v7819_v26 = vpop.f32.mrb[39].mxu0  ;;  %v7844_v57 = vpop.f32.mrb[37].mxu1 }
 0x6d6   : > { %v5938_v27 = vadd.f32 %v5937_v1, %v5862_v22 }
 0x6d7   : > { %v6011_v41 = vpop.f32.mrb[40].mxu0 }
 0x6d8   : > { %v6012_v38 = vadd.f32 %v6011_v41, %v5938_v27  ;;  %v7829_v62 = vpop.f32.mrb[41].mxu0 }
 0x6da   : > { %v6086_v59 = vadd.f32 %v6085_v14, %v6012_v38 }
 0x6db   : > { %v6159_v16 = vpop.f32.mrb[42].mxu0 }
 0x6dc   : > { %v6160_v11 = vadd.f32 %v6159_v16, %v6086_v59  ;;  %v7839_v8 = vpop.f32.mrb[43].mxu0 }
 0x6de   : > { %v6232_v44 = vadd.f32 %v6231_v20, %v6160_v11 }
 0x6e0   : > { %v6242_v24 = vadd.f32 %v7377_v31, %v6232_v44 }
 0x6e2   : > { %v6243_v39 = vmax.f32 %v6242_v24, 0.0 }
 0x6e4   : > { %v6254_v21 = vsel %vm1996_vm5, %v6243_v39, 0  ;;  %vm7173_vm5 = vcmask 261120  }
 0x6e5   : > { %v6323_v54 = vand.u32 4294901760, %v6254_v21 }
 0x6e7   : > { %v6324_v48 = vsub.f32 %v6254_v21, %v6323_v54 }
 0x6e9   : > { %v6325_v49 = vand.u32 4294901760, %v6324_v48 }
 0x6eb   : > { %v6326_v45 = vsub.f32 %v6324_v48, %v6325_v49 }
 0x6ed   : > { %v6327_v46 = vand.u32 4294901760, %v6326_v45 }
 0x6ef   : > { %7850 = vmatmul.mubr.f32.vlgmr.msra.gmra.mrb[44].mxu0 %v6327_v46 }
 0x6f0   : > { %7922 = vmatpush3.bf16.msra.mxu0 %v7921_v53  ;;  %7856 = vmatprep.mubr.msk.f32.mxu0 %vm8256_vm1, %v8255_v6 }
 0x6f1   : > { %7923 = vmatprep.subr.bf16.mxu0 %v8259_v25 }
 0x6f7   : > { %7857 = vmatmul.mubr.f32.vlgmr.msra.gmra.mrb[44].mxu0 %v6323_v54 }
 0x6f8   : > { %7925 = vmatpush3.bf16.msra.mxu0 %v7924_v10  ;;  %7863 = vmatprep.mubr.msk.f32.mxu0 %vm8256_vm1, %v8255_v6 }
 0x6f9   : > { %7926 = vmatprep.subr.bf16.mxu0 %v8259_v25 }
 0x6ff   : > { %7864 = vmatmul.mubr.f32.vlgmr.msra.gmra.mrb[44].mxu0 %v6324_v48 }
 0x700   : > { %7928 = vmatpush3.bf16.msra.mxu0 %v7918_v47  ;;  %7870 = vmatprep.mubr.msk.f32.mxu0 %vm8256_vm1, %v8255_v6 }
 0x701   : > { %7929 = vmatprep.subr.bf16.mxu0 %v8259_v25 }
 0x707   : > { %7871 = vmatmul.mubr.f32.vlgmr.msra.gmra.mrb[44].mxu0 %v6325_v49 }
 0x708   : > { %7931 = vmatpush3.bf16.msra.mxu0 %v7930_v13  ;;  %7877 = vmatprep.mubr.msk.f32.mxu0 %vm8256_vm1, %v8255_v6 }
 0x709   : > { %7932 = vmatprep.subr.bf16.mxu0 %v8259_v25 }
 0x70f   : > { %7878 = vmatmul.mubr.f32.vlgmr.msra.gmra.mrb[44].mxu0 %v6323_v54 }
 0x710   : > { %7934 = vmatpush3.bf16.msra.mxu0 %v7918_v47  ;;  %7884 = vmatprep.mubr.msk.f32.mxu0 %vm8256_vm1, %v8255_v6 }
 0x711   : > { %7887 = vmatprep.subr.mxu0 %v8255_v6 }
 0x717   : > { %7885 = vmatmul.mubr.f32.vlgmr.msra.gmra.mrb[44].mxu0 %v6323_v54 }
 0x718   : > { %7888 = vmatpush3.msra.mxu0 %v6724_v55  ;;  %7889 = vmatprep.mubr.msk.f32.mxu0 %vm8256_vm1, %v8255_v6 }
 0x719   : > { %7892 = vmatprep.subr.mxu0 %v8255_v6 }
 0x71f   : > { %7890 = vmatmul.mubr.f32.vlgmr.msra.gmra.mrb[44].mxu0 %v8643_v28 }
 0x720   : > { %7893 = vmatpush3.msra.mxu0 %v6804_v40  ;;  %7894 = vmatprep.mubr.msk.f32.mxu0 %vm8256_vm1, %v8255_v6 }
 0x721   : > { %7897 = vmatprep.subr.mxu0 %v8255_v6 }
 0x727   : > { %7895 = vmatmul.mubr.f32.vlgmr.msra.gmra.mrb[44].mxu0 %v8620_v9 }
 0x728   : > { %7898 = vmatpush3.msra.mxu0 %v6801_v30  ;;  %7899 = vmatprep.mubr.msk.f32.mxu0 %vm8256_vm1, %v8255_v6 }
 0x729   : > { %7902 = vmatprep.subr.mxu0 %v8255_v6 }
 0x72f   : > { %7900 = vmatmul.mubr.f32.vlgmr.msra.gmra.mrb[44].mxu0 %v8628_v19  ;;  %v7378_v19 = vld [vmem:[%s9299_s22] ss:$0 sm:$0xff] }
 0x730   : > { %7903 = vmatpush3.msra.mxu0 %v6724_v55  ;;  %7904 = vmatprep.mubr.msk.f32.mxu0 %vm8256_vm1, %v8255_v6 }
 0x731   : > { %7907 = vmatprep.subr.mxu0 %v8255_v6 }
 0x737   : > { %7905 = vmatmul.mubr.f32.vlgmr.msra.gmra.mrb[44].mxu0 %v8636_v23  ;;  %v7379_v23 = vld [vmem:[%s9353_s28] ss:$0 sm:$0xff]  ;;  %s8164_s28 = scalar_lea.vmem %s8163_s26, 256 }
 0x738   : > { %7908 = vmatpush3.msra.mxu0 %v6802_v60  ;;  %7909 = vmatprep.mubr.msk.f32.mxu0 %vm8256_vm1, %v8255_v6  ;;  %v7938_v28 = vadd.f32 %v7379_v23, %v7378_v19  ;;  %p8166_p6 = scmp.lt.s32.totalorder %s8164_s28, %s8158_s7 }
 0x739   : > { %7912 = vmatprep.subr.mxu0 %v8255_v6 }
 0x73a   : > { %p8167_p7 = por %p8166_p6, %p8165_p5 }
 0x73c   : > { %p8168_p9 = pnand %p8167_p7, %p8161_p4 }
 0x73f   : > { %7910 = vmatmul.mubr.f32.vlgmr.msra.gmra.mrb[44].mxu0 %v8620_v9 }
 0x740   : > { %7913 = vmatpush3.msra.mxu0 %v6724_v55  ;;  %7914 = vmatprep.mubr.msk.f32.mxu0 %vm8256_vm1, %v8255_v6 }
 0x747   : > { %7915 = vmatmul.mubr.f32.vlgmr.msra.gmra.mrb[44].mxu0 %v8620_v9 }
 0x81a   : > { %v7165_v33 = vpop.f32.mrb[44].mxu0 }
 0x81b   : > { %v7939_v63 = vadd.f32 %v7938_v28, %v7165_v33  ;;  %v7916_v35 = vpop.f32.mrb[45].mxu0 }
 0x81d   : > { %vm7170_vm1 = vcmp.ge.f32.partialorder %v7939_v63, 0.0  ;;  %v7171_v6 = vmul.f32 0.01, %v7939_v63 }
 0x81f   : > { %v7172_v9 = vsel %vm7170_vm1, %v7939_v63, %v7171_v6 }
 0x820   : > { %7174 = vst.msk [vmem:[%s869_s11] sm:$0xff] %vm7173_vm5, %v7172_v9 }
 0x821   : > { %8171 = shalt.err (!%p8168_p9)
}
 0x822   : > { %s8172_s10 = scalar_lea.hbm %s9224_s14, 128  ;;  %s8176_s29 = scalar_lea.hbm %s9355_s13, 512 }
 0x823   : > { %p8173_p10 = scmp.ne.s32.totalorder %s9224_s14, %s8172_s10  ;;  %p8177_p13 = scmp.lt.u32.totalorder %s9224_s14, %s9355_s13 }
 0x824   : > { %p8178_p0 = scmp.lt.u32.totalorder %s8176_s29, %s8172_s10  ;;  %p8180_p2 = scmp.lt.u32.totalorder %s8172_s10, %s9224_s14 }
 0x825   : > { %p8174_p11 = pnand %p8173_p10, %p8442_p3 }
 0x826   : > { %p8179_p1 = por %p8178_p0, %p8177_p13 }
 0x827   : > { %p8175_p12 = pneg %p8174_p11 }
 0x828   : > { %p8181_p4 = por %p8180_p2, %p8179_p1 }
 0x82a   : > { %p8182_p5 = pnand %p8181_p4, %p8175_p12 }
 0x82c   : > { %8185 = shalt.err (!%p8182_p5)
}
 0x82d   : > { %8015 = dma.vmem_to_hbm [thread:$0]  (%p8442_p3), %s9226_s12, 128, %s9224_s14, %s7176_s30  }
 0x82e PF: > { %s9356_s27 = sld [smem:[#allocation5_spill]]  ;;  %p8021_p6 = scmp.ge.s32.totalorder %s8252_s1, 2 }
 0x830   : > { %p8018_p7 = pnand %p8021_p6, %p8451_p8 }
 0x834   : > { %s7203_s9 = sand.u32 1, %s9356_s27  }
 0x835   : > { %s7204_s7 = scalar_lea.sflag [#allocation3], %s7203_s9 }
 0x836   : > { %8219 = dma.done.wait (!%p8018_p7), %s7204_s7, 128  }
 0x837   : > { %8221 = vsyncadd (!%p8018_p7), %s7204_s7, 4294967168  ;;  %s38_s1 = sadd.s32 1, %s8252_s1   ;;  %s9357_s30 = sld [smem:[#allocation6_spill]] }
 0x838   : > { %p35_p9 = scmp.ge.s32.totalorder %s38_s1, 6   ;;  %s9358_s7 = sld [smem:[#allocation7_spill]] }
 0x839   : > { %s9359_s3 = sld [smem:[#allocation8_spill]]  ;;  %s9360_s26 = sld [smem:[#allocation10_spill]] }
 0x83a   : > { %s9361_s29 = smov %s8228_s2  ;;  %s9362_s2 = smov %s8232_s6 }
 0x83b   : > { %s9363_s6 = smov %s8460_s4  ;;  %37 = sbr.rel (!%p35_p9) target bundleno = 23 (0x17), region = 167 }
 0x842   :  { %7209 = vsyncpa [#allocation3], 1 }
 0x843   :  { %7211 = vsyncpa [#allocation3 + $0x1], 1 }

</bundles_post_ra>
